<compile_context>
chip_gen: v7x
topology: tpu7x:2x2x1
jax: 0.10.0
libtpu: 0.0.40
codegen_flags: <defaults>
</compile_context>

<pallas_src>
import functools
import math

import jax
import jax.numpy as jnp
from jax.experimental import pallas as pl
from jax.experimental.pallas import tpu as pltpu


_LN_EPS = 1e-5
_VMEM_CAP = 64 * 1024 * 1024   # v7x physical VMEM per TensorCore


def _vmem_limit(block_bytes, scratch_bytes):
    """Explicit scoped-VMEM budget: 2x (double-buffered) blocks + scratch + margin."""
    est = int(1.25 * (2 * block_bytes + scratch_bytes)) + (1 << 20)
    return max(min(est, _VMEM_CAP), 16 * 1024 * 1024)


def _layernorm_f32(x, gamma, beta):
    mu = jnp.mean(x, axis=-1, keepdims=True)
    xc = x - mu
    var = jnp.mean(xc * xc, axis=-1, keepdims=True)
    return xc * jax.lax.rsqrt(var + _LN_EPS) * gamma + beta


# --------------------------------------------------------------------------
# Fused LayerNorm + multi-head attention (+ residual)
# --------------------------------------------------------------------------
def _mha_kernel(x_ref, xres_ref, g_ref, b_ref, wqkv_ref, bv_ref,
                o_ref, attn_ref, xn_sc, k_sc, v_sc, q_sc,
                *, d_model, dk, hg, n_hg, tq, scale):
    qi = pl.program_id(1)
    hi = pl.program_id(2)
    hgd = hg * dk

    # Once per batch element: LN over the full sequence, then K/V projections
    # (all heads) into scratch, reused by every q-tile / head-group step.
    @pl.when((qi == 0) & (hi == 0))
    def _():
        xn = _layernorm_f32(x_ref[0].astype(jnp.float32),
                            g_ref[...].astype(jnp.float32),
                            b_ref[...].astype(jnp.float32))
        xn_lo = xn.astype(xn_sc.dtype)          # native dtype -> fast MXU path
        xn_sc[...] = xn_lo
        for j in range(n_hg):                    # static
            ck = d_model + j * hgd
            cv = 2 * d_model + j * hgd
            k_sc[j] = jnp.dot(xn_lo, wqkv_ref[:, ck:ck + hgd],
                              preferred_element_type=jnp.float32).astype(k_sc.dtype)
            v = jnp.dot(xn_lo, wqkv_ref[:, cv:cv + hgd],
                        preferred_element_type=jnp.float32)
            v = v + bv_ref[:, j * hgd:(j + 1) * hgd].astype(jnp.float32)
            v_sc[j] = v.astype(v_sc.dtype)

    # Once per q-tile: Q projection for all heads of this tile.
    @pl.when(hi == 0)
    def _():
        row0 = pl.multiple_of(qi * tq, tq)
        xt = xn_sc[pl.ds(row0, tq), :]
        for j in range(n_hg):                    # static
            q_sc[j] = jnp.dot(xt, wqkv_ref[:, j * hgd:(j + 1) * hgd],
                              preferred_element_type=jnp.float32).astype(q_sc.dtype)

    # Attention for this (q-tile, head-group).
    qg = q_sc[hi]                                # (tq, hgd) native dtype
    kg = k_sc[hi]                                # (s,  hgd)
    vg = v_sc[hi]                                # (s,  hgd)
    heads = []
    for g in range(hg):                          # static; hg*dk >= 128 when possible
        lo = g * dk
        qh = qg[:, lo:lo + dk]
        kh = kg[:, lo:lo + dk]
        vh = vg[:, lo:lo + dk]
        sc = jax.lax.dot_general(qh, kh, (((1,), (1,)), ((), ())),
                                 preferred_element_type=jnp.float32) * scale
        sc = sc - jnp.max(sc, axis=-1, keepdims=True)
        e = jnp.exp(sc)
        a = e / jnp.sum(e, axis=-1, keepdims=True)           # softmax over keys
        attn_ref[0, g, :, :] = a.astype(attn_ref.dtype)
        heads.append(jnp.dot(a.astype(vh.dtype), vh,
                             preferred_element_type=jnp.float32))
    out = heads[0] if hg == 1 else jnp.concatenate(heads, axis=-1)   # (tq, hgd)
    out = out + xres_ref[0].astype(jnp.float32)                      # residual
    o_ref[0, :, :] = out.astype(o_ref.dtype)


def _pick_q_tile(s, block_q):
    if s <= block_q:
        return s
    for t in range(block_q, 0, -1):              # prefer multiple-of-8 divisors
        if s % t == 0 and t % 8 == 0:
            return t
    for t in range(block_q, 0, -1):
        if s % t == 0:
            return t
    return s


def _pick_heads_per_step(nhead, dk, d_model):
    """Smallest divisor of nhead with hg*dk >= 128 (MXU N-dim utilization)."""
    hg = nhead
    for cand in range(1, nhead + 1):
        if nhead % cand:
            continue
        hg = cand
        if cand * dk >= 128:
            break
    # output / residual blocks are (.., hg*dk): keep them lane-legal.
    if (hg * dk) % 128 != 0 and hg * dk != d_model:
        hg = nhead
    return hg


def mha_block(x, ln_g, ln_b, wqkv, bv, *, nhead, block_q=256):
    b, s, d = x.shape
    dk = d // nhead
    scale = 1.0 / math.sqrt(dk)
    tq = _pick_q_tile(s, block_q)
    hg = _pick_heads_per_step(nhead, dk, d)
    n_qt = s // tq
    n_hg = nhead // hg
    hgd = hg * dk

    kernel = functools.partial(_mha_kernel, d_model=d, dk=dk, hg=hg,
                               n_hg=n_hg, tq=tq, scale=scale)

    elt = jnp.dtype(x.dtype).itemsize
    w_elt = jnp.dtype(wqkv.dtype).itemsize
    block_bytes = (s * d * elt + tq * hgd * elt + 2 * d * elt
                   + 3 * d * d * w_elt + d * w_elt
                   + tq * hgd * elt + hg * tq * s * elt)
    scratch_bytes = (3 * s * d + tq * d) * elt
    cost = pl.CostEstimate(
        flops=int(b * (2 * s * d * 3 * d + 4 * s * s * d)),
        transcendentals=int(b * nhead * s * s),
        bytes_accessed=int(elt * (2 * b * s * d + b * nhead * s * s + 2 * d)
                           + w_elt * (wqkv.size + bv.size)),
    )

    out, attn = pl.pallas_call(
        kernel,
        out_shape=(jax.ShapeDtypeStruct((b, s, d), x.dtype),
                   jax.ShapeDtypeStruct((b, nhead, s, s), x.dtype)),
        grid_spec=pltpu.PrefetchScalarGridSpec(
            num_scalar_prefetch=0,
            grid=(b, n_qt, n_hg),
            in_specs=[
                pl.BlockSpec((1, s, d), lambda bi, qi, hi: (bi, 0, 0)),      # x (LN/KV)
                pl.BlockSpec((1, tq, hgd), lambda bi, qi, hi: (bi, qi, hi)),  # x (residual)
                pl.BlockSpec((1, d), lambda bi, qi, hi: (0, 0)),
                pl.BlockSpec((1, d), lambda bi, qi, hi: (0, 0)),
                pl.BlockSpec((d, 3 * d), lambda bi, qi, hi: (0, 0)),
                pl.BlockSpec((1, d), lambda bi, qi, hi: (0, 0)),
            ],
            out_specs=(
                pl.BlockSpec((1, tq, hgd), lambda bi, qi, hi: (bi, qi, hi)),
                pl.BlockSpec((1, hg, tq, s), lambda bi, qi, hi: (bi, hi, qi, 0)),
            ),
            scratch_shapes=[
                pltpu.VMEM((s, d), x.dtype),          # LN(x) for the whole sequence
                pltpu.VMEM((n_hg, s, hgd), x.dtype),  # K (all heads)
                pltpu.VMEM((n_hg, s, hgd), x.dtype),  # V (all heads)
                pltpu.VMEM((n_hg, tq, hgd), x.dtype), # Q (current q-tile)
            ],
        ),
        compiler_params=pltpu.CompilerParams(
            dimension_semantics=("parallel", "arbitrary", "arbitrary"),
            vmem_limit_bytes=_vmem_limit(block_bytes, scratch_bytes)),
        cost_estimate=cost,
    )(x, x, ln_g, ln_b, wqkv, bv)
    return out, attn


# --------------------------------------------------------------------------
# Fused LayerNorm + FeedForward (+ residual)
# --------------------------------------------------------------------------
def _ffn_kernel(x_ref, g_ref, bln_ref, w1_ref, b1_ref, w2_ref, b2_ref,
                o_ref, xn_sc, acc_ref):
    kh = pl.program_id(1)

    @pl.when(kh == 0)
    def _():
        xn = _layernorm_f32(x_ref[...].astype(jnp.float32),
                            g_ref[...].astype(jnp.float32),
                            bln_ref[...].astype(jnp.float32))
        xn_sc[...] = xn.astype(xn_sc.dtype)
        acc_ref[...] = jnp.zeros_like(acc_ref)

    # (tm, D) @ (D, th): native-dtype operands, f32 accumulation on the MXU.
    h = jnp.dot(xn_sc[...], w1_ref[...], preferred_element_type=jnp.float32)
    h = h + b1_ref[...].astype(jnp.float32)
    # Exact erf GELU (torch.nn.GELU default); Dropout(p=0) is identity.
    h = 0.5 * h * (1.0 + jax.lax.erf(h * 0.7071067811865476))
    acc_ref[...] += jnp.dot(h.astype(w2_ref.dtype), w2_ref[...],
                            preferred_element_type=jnp.float32)

    @pl.when(kh == pl.num_programs(1) - 1)
    def _():
        out = acc_ref[...] + b2_ref[...].astype(jnp.float32)
        out = out + x_ref[...].astype(jnp.float32)            # residual (raw x)
        o_ref[...] = out.astype(o_ref.dtype)


def _pick_hidden_tile(hidden, block_h):
    if hidden <= block_h:
        return hidden
    t = (block_h // 128) * 128
    while t >= 128:
        if hidden % t == 0:
            return t
        t -= 128
    # TODO(synk): pad hidden when it has no multiple-of-128 divisor.
    return hidden


def ffn_block(x, ln_g, ln_b, w1, b1, w2, b2, *, block_m=512, block_h=512):
    orig_shape = x.shape
    d = orig_shape[-1]
    hidden = w1.shape[1]

    x2 = x.reshape(-1, d)
    m = x2.shape[0]
    tm = min(block_m, m)
    m_pad = pl.cdiv(m, tm) * tm
    if m_pad != m:
        x2 = jnp.pad(x2, ((0, m_pad - m), (0, 0)))
    th = _pick_hidden_tile(hidden, block_h)

    elt = jnp.dtype(x.dtype).itemsize
    w_elt = jnp.dtype(w1.dtype).itemsize
    block_bytes = (2 * tm * d * elt + d * th * w_elt + th * w_elt
                   + th * d * w_elt + d * w_elt + 2 * d * elt)
    scratch_bytes = tm * d * (4 + elt)
    cost = pl.CostEstimate(
        flops=int(4 * m * d * hidden),
        transcendentals=int(m * hidden),
        bytes_accessed=int(elt * (2 * m * d + 2 * d)
                           + w_elt * (w1.size + w2.size + b1.size + b2.size)),
    )

    out = pl.pallas_call(
        _ffn_kernel,
        out_shape=jax.ShapeDtypeStruct((m_pad, d), x.dtype),
        grid_spec=pltpu.PrefetchScalarGridSpec(
            num_scalar_prefetch=0,
            grid=(m_pad // tm, hidden // th),
            in_specs=[
                pl.BlockSpec((tm, d), lambda i, k: (i, 0)),
                pl.BlockSpec((1, d), lambda i, k: (0, 0)),
                pl.BlockSpec((1, d), lambda i, k: (0, 0)),
                pl.BlockSpec((d, th), lambda i, k: (0, k)),
                pl.BlockSpec((1, th), lambda i, k: (0, k)),
                pl.BlockSpec((th, d), lambda i, k: (k, 0)),
                pl.BlockSpec((1, d), lambda i, k: (0, 0)),
            ],
            out_specs=pl.BlockSpec((tm, d), lambda i, k: (i, 0)),
            scratch_shapes=[pltpu.VMEM((tm, d), x.dtype),
                            pltpu.VMEM((tm, d), jnp.float32)],
        ),
        compiler_params=pltpu.CompilerParams(
            dimension_semantics=("parallel", "arbitrary"),
            vmem_limit_bytes=_vmem_limit(block_bytes, scratch_bytes)),
        cost_estimate=cost,
    )(x2, ln_g, ln_b, w1, b1, w2, b2)
    return out[:m].reshape(orig_shape)


# --------------------------------------------------------------------------
# Full Transformer forward
# --------------------------------------------------------------------------
@functools.partial(jax.jit, static_argnames=("nhead",))
def transformer_forward(x, params, *, nhead):
    attn_maps = []
    for lyr in params:
        x, amap = mha_block(x, lyr["ln1_g"], lyr["ln1_b"],
                            lyr["wqkv"], lyr["bv"], nhead=nhead)
        # torch layout (b, i, j, h); consumers that only inspect maps can keep
        # the kernel's (b, h, i, j) layout and skip this transpose.
        attn_maps.append(jnp.transpose(amap, (0, 2, 3, 1)))
        x = ffn_block(x, lyr["ln2_g"], lyr["ln2_b"],
                      lyr["w1"], lyr["b1"], lyr["w2"], lyr["b2"])
    return x, attn_maps


def init_transformer_params(key, d_model, nhead, num_layers, hidden_scale=4,
                            dtype=jnp.float32):
    """torch.nn.Linear-style uniform(+-1/sqrt(fan_in)) init; LN gamma=1, beta=0.
    Linear weights stored as (in_features, out_features); q/k/v fused as (d, 3d)."""
    hidden = int(d_model * hidden_scale)
    b_d = 1.0 / math.sqrt(d_model)
    b_h = 1.0 / math.sqrt(hidden)
    params = []
    for _ in range(num_layers):
        key, k1, k2, k3, k4, k5, k6, k7, k8 = jax.random.split(key, 9)
        wq = jax.random.uniform(k1, (d_model, d_model), dtype, -b_d, b_d)
        wk = jax.random.uniform(k2, (d_model, d_model), dtype, -b_d, b_d)
        wv = jax.random.uniform(k3, (d_model, d_model), dtype, -b_d, b_d)
        params.append(dict(
            ln1_g=jnp.ones((1, d_model), dtype),
            ln1_b=jnp.zeros((1, d_model), dtype),
            wqkv=jnp.concatenate([wq, wk, wv], axis=1),
            bv=jax.random.uniform(k4, (1, d_model), dtype, -b_d, b_d),
            ln2_g=jnp.ones((1, d_model), dtype),
            ln2_b=jnp.zeros((1, d_model), dtype),
            w1=jax.random.uniform(k5, (d_model, hidden), dtype, -b_d, b_d),
            b1=jax.random.uniform(k6, (1, hidden), dtype, -b_d, b_d),
            w2=jax.random.uniform(k7, (hidden, d_model), dtype, -b_h, b_h),
            b2=jax.random.uniform(k8, (1, d_model), dtype, -b_h, b_h),
        ))
    return params


def reference_transformer(x, params, nhead):
    """Pure-JAX reference of the torch module (mask=None, dropout p=0)."""
    def ln(x, g, b):
        mu = jnp.mean(x, axis=-1, keepdims=True)
        var = jnp.mean((x - mu) ** 2, axis=-1, keepdims=True)
        return (x - mu) * jax.lax.rsqrt(var + _LN_EPS) * g[0] + b[0]

    def gelu(h):
        return 0.5 * h * (1.0 + jax.lax.erf(h * 0.7071067811865476))

    attn_maps = []
    for lyr in params:
        d = x.shape[-1]
        wq, wk, wv = (lyr["wqkv"][:, :d], lyr["wqkv"][:, d:2 * d],
                      lyr["wqkv"][:, 2 * d:])
        xn = ln(x, lyr["ln1_g"], lyr["ln1_b"])
        q = xn @ wq
        k = xn @ wk
        v = xn @ wv + lyr["bv"][0]
        b, s, _ = q.shape
        dk = d // nhead
        qh = q.reshape(b, s, nhead, dk)
        kh = k.reshape(b, s, nhead, dk)
        vh = v.reshape(b, s, nhead, dk)
        scores = jnp.einsum("bihd,bjhd->bijh", qh, kh) / math.sqrt(dk)
        attn = jax.nn.softmax(scores, axis=2)
        attn_maps.append(attn)
        out = jnp.einsum("bijh,bjhd->bihd", attn, vh).reshape(b, s, d)
        x = out + x
        xn = ln(x, lyr["ln2_g"], lyr["ln2_b"])
        h = gelu(xn @ lyr["w1"] + lyr["b1"][0])
        x = h @ lyr["w2"] + lyr["b2"][0] + x
    return x, attn_maps


if __name__ == "__main__":
    d_model, nhead, num_layers, hidden_scale = 32, 4, 2, 4
    batch, seq = 2, 8

    key = jax.random.PRNGKey(0)
    kx, kp = jax.random.split(key)
    x = jax.random.normal(kx, (batch, seq, d_model), jnp.float32)
    params = init_transformer_params(kp, d_model, nhead, num_layers, hidden_scale)

    y, attn_maps = transformer_forward(x, params, nhead=nhead)
    y = jax.block_until_ready(y)

    y_ref, attn_ref = reference_transformer(x, params, nhead)

    assert y.shape == x.shape
    assert len(attn_maps) == num_layers
    assert jnp.allclose(y, y_ref, atol=5e-4, rtol=5e-4), "output mismatch vs reference"
    for a, ar in zip(attn_maps, attn_ref):
        assert a.shape == (batch, seq, seq, nhead)
        assert jnp.allclose(a, ar, atol=5e-4, rtol=5e-4), "attn map mismatch vs reference"

    print("KERNEL_OK")
</pallas_src>

<mosaic_0001>
module attributes {stable_mosaic.version = 11 : i64} {
  func.func @_ffn_kernel(%arg0: i32, %arg1: i32, %arg2: memref<16x32xf32, #tpu.memory_space<vmem>>, %arg3: memref<1x32xf32, #tpu.memory_space<vmem>>, %arg4: memref<1x32xf32, #tpu.memory_space<vmem>>, %arg5: memref<32x128xf32, #tpu.memory_space<vmem>>, %arg6: memref<1x128xf32, #tpu.memory_space<vmem>>, %arg7: memref<128x32xf32, #tpu.memory_space<vmem>>, %arg8: memref<1x32xf32, #tpu.memory_space<vmem>>, %arg9: memref<16x32xf32, #tpu.memory_space<vmem>>, %arg10: memref<16x32xf32, #tpu.memory_space<vmem>>, %arg11: memref<16x32xf32, #tpu.memory_space<vmem>>) attributes {dimension_semantics = [#tpu.dimension_semantics<parallel>, #tpu.dimension_semantics<arbitrary>], iteration_bounds = array<i64: 1, 1>, scalar_prefetch = 0 : i64, scratch_operands = 2 : i64, tpu.core_type = #tpu.core_type<tc>, window_params = [{transform_indices = @transform_0, window_bounds = array<i64: 16, 32>}, {pipeline_mode = #tpu.pipeline_mode<synchronous>, transform_indices = @transform_1, window_bounds = array<i64: 1, 32>}, {pipeline_mode = #tpu.pipeline_mode<synchronous>, transform_indices = @transform_2, window_bounds = array<i64: 1, 32>}, {transform_indices = @transform_3, window_bounds = array<i64: 32, 128>}, {transform_indices = @transform_4, window_bounds = array<i64: 1, 128>}, {transform_indices = @transform_5, window_bounds = array<i64: 128, 32>}, {pipeline_mode = #tpu.pipeline_mode<synchronous>, transform_indices = @transform_6, window_bounds = array<i64: 1, 32>}, {transform_indices = @transform_7, window_bounds = array<i64: 16, 32>}]} {
    %c0_i32 = arith.constant 0 : i32
    %0 = arith.cmpi eq, %arg1, %c0_i32 : i32
    %1 = arith.extui %0 : i1 to i32
    %c0_i32_0 = arith.constant 0 : i32
    %2 = arith.cmpi ne, %1, %c0_i32_0 : i32
    scf.if %2 {
      %c0_18 = arith.constant 0 : index
      %c0_19 = arith.constant 0 : index
      %25 = vector.load %arg2[%c0_18, %c0_19] : memref<16x32xf32, #tpu.memory_space<vmem>>, vector<16x32xf32>
      %c0_20 = arith.constant 0 : index
      %c0_21 = arith.constant 0 : index
      %26 = vector.load %arg3[%c0_20, %c0_21] : memref<1x32xf32, #tpu.memory_space<vmem>>, vector<1x32xf32>
      %c0_22 = arith.constant 0 : index
      %c0_23 = arith.constant 0 : index
      %27 = vector.load %arg4[%c0_22, %c0_23] : memref<1x32xf32, #tpu.memory_space<vmem>>, vector<1x32xf32>
      %cst_24 = arith.constant dense<0.000000e+00> : vector<16xf32>
      %28 = vector.multi_reduction <add>, %25, %cst_24 [1] : vector<16x32xf32> to vector<16xf32>
      %29 = vector.shape_cast %28 : vector<16xf32> to vector<16x1xf32>
      %cst_25 = arith.constant 3.200000e+01 : f32
      %30 = vector.broadcast %cst_25 : f32 to vector<16x1xf32>
      %31 = arith.divf %29, %30 : vector<16x1xf32>
      %32 = vector.broadcast %31 : vector<16x1xf32> to vector<16x32xf32>
      %33 = arith.subf %25, %32 : vector<16x32xf32>
      %34 = arith.mulf %33, %33 : vector<16x32xf32>
      %cst_26 = arith.constant dense<0.000000e+00> : vector<16xf32>
      %35 = vector.multi_reduction <add>, %34, %cst_26 [1] : vector<16x32xf32> to vector<16xf32>
      %36 = vector.shape_cast %35 : vector<16xf32> to vector<16x1xf32>
      %cst_27 = arith.constant 3.200000e+01 : f32
      %37 = vector.broadcast %cst_27 : f32 to vector<16x1xf32>
      %38 = arith.divf %36, %37 : vector<16x1xf32>
      %cst_28 = arith.constant 9.99999974E-6 : f32
      %39 = vector.broadcast %cst_28 : f32 to vector<16x1xf32>
      %40 = arith.addf %38, %39 : vector<16x1xf32>
      %41 = math.rsqrt %40 : vector<16x1xf32>
      %42 = vector.broadcast %41 : vector<16x1xf32> to vector<16x32xf32>
      %43 = arith.mulf %33, %42 : vector<16x32xf32>
      %44 = vector.broadcast %26 : vector<1x32xf32> to vector<16x32xf32>
      %45 = arith.mulf %43, %44 : vector<16x32xf32>
      %46 = vector.broadcast %27 : vector<1x32xf32> to vector<16x32xf32>
      %47 = arith.addf %45, %46 : vector<16x32xf32>
      %c0_29 = arith.constant 0 : index
      %c0_30 = arith.constant 0 : index
      %48 = vector.load %arg10[%c0_29, %c0_30] : memref<16x32xf32, #tpu.memory_space<vmem>>, vector<16x32xf32>
      tpu.vector_store %arg10[%c0_29, %c0_30], %47 {strides = array<i32>} : memref<16x32xf32, #tpu.memory_space<vmem>>, vector<16x32xf32>,
      %cst_31 = arith.constant 0.000000e+00 : f32
      %49 = vector.broadcast %cst_31 : f32 to vector<16x32xf32>
      %c0_32 = arith.constant 0 : index
      %c0_33 = arith.constant 0 : index
      %50 = vector.load %arg11[%c0_32, %c0_33] : memref<16x32xf32, #tpu.memory_space<vmem>>, vector<16x32xf32>
      tpu.vector_store %arg11[%c0_32, %c0_33], %49 {strides = array<i32>} : memref<16x32xf32, #tpu.memory_space<vmem>>, vector<16x32xf32>,
    } else {
    }
    %c0 = arith.constant 0 : index
    %c0_1 = arith.constant 0 : index
    %3 = vector.load %arg10[%c0, %c0_1] : memref<16x32xf32, #tpu.memory_space<vmem>>, vector<16x32xf32>
    %c0_2 = arith.constant 0 : index
    %c0_3 = arith.constant 0 : index
    %4 = vector.load %arg5[%c0_2, %c0_3] : memref<32x128xf32, #tpu.memory_space<vmem>>, vector<32x128xf32>
    %cst = arith.constant dense<0.000000e+00> : vector<16x128xf32>
    %5 = tpu.matmul %3, %4, %cst {dimension_numbers = #tpu.dot_dimension_numbers<[1], [0], [0], [1], [0, 0, 1, 1], [], []>} : vector<16x32xf32>, vector<32x128xf32>, vector<16x128xf32> -> vector<16x128xf32>
    %c0_4 = arith.constant 0 : index
    %c0_5 = arith.constant 0 : index
    %6 = vector.load %arg6[%c0_4, %c0_5] : memref<1x128xf32, #tpu.memory_space<vmem>>, vector<1x128xf32>
    %7 = vector.broadcast %6 : vector<1x128xf32> to vector<16x128xf32>
    %8 = arith.addf %5, %7 : vector<16x128xf32>
    %cst_6 = arith.constant 5.000000e-01 : f32
    %9 = vector.broadcast %cst_6 : f32 to vector<16x128xf32>
    %10 = arith.mulf %9, %8 : vector<16x128xf32>
    %cst_7 = arith.constant 0.707106769 : f32
    %11 = vector.broadcast %cst_7 : f32 to vector<16x128xf32>
    %12 = arith.mulf %8, %11 : vector<16x128xf32>
    %13 = math.erf %12 : vector<16x128xf32>
    %cst_8 = arith.constant 1.000000e+00 : f32
    %14 = vector.broadcast %cst_8 : f32 to vector<16x128xf32>
    %15 = arith.addf %14, %13 : vector<16x128xf32>
    %16 = arith.mulf %10, %15 : vector<16x128xf32>
    %c0_9 = arith.constant 0 : index
    %c0_10 = arith.constant 0 : index
    %17 = vector.load %arg11[%c0_9, %c0_10] : memref<16x32xf32, #tpu.memory_space<vmem>>, vector<16x32xf32>
    %c0_11 = arith.constant 0 : index
    %c0_12 = arith.constant 0 : index
    %18 = vector.load %arg7[%c0_11, %c0_12] : memref<128x32xf32, #tpu.memory_space<vmem>>, vector<128x32xf32>
    %cst_13 = arith.constant dense<0.000000e+00> : vector<16x32xf32>
    %19 = tpu.matmul %16, %18, %cst_13 {dimension_numbers = #tpu.dot_dimension_numbers<[1], [0], [0], [1], [0, 0, 1, 1], [], []>} : vector<16x128xf32>, vector<128x32xf32>, vector<16x32xf32> -> vector<16x32xf32>
    %20 = arith.addf %17, %19 : vector<16x32xf32>
    %c0_14 = arith.constant 0 : index
    %c0_15 = arith.constant 0 : index
    %21 = vector.load %arg11[%c0_14, %c0_15] : memref<16x32xf32, #tpu.memory_space<vmem>>, vector<16x32xf32>
    tpu.vector_store %arg11[%c0_14, %c0_15], %20 {strides = array<i32>} : memref<16x32xf32, #tpu.memory_space<vmem>>, vector<16x32xf32>,
    %c0_i32_16 = arith.constant 0 : i32
    %22 = arith.cmpi eq, %arg1, %c0_i32_16 : i32
    %23 = arith.extui %22 : i1 to i32
    %c0_i32_17 = arith.constant 0 : i32
    %24 = arith.cmpi ne, %23, %c0_i32_17 : i32
    scf.if %24 {
      %c0_18 = arith.constant 0 : index
      %c0_19 = arith.constant 0 : index
      %25 = vector.load %arg11[%c0_18, %c0_19] : memref<16x32xf32, #tpu.memory_space<vmem>>, vector<16x32xf32>
      %c0_20 = arith.constant 0 : index
      %c0_21 = arith.constant 0 : index
      %26 = vector.load %arg8[%c0_20, %c0_21] : memref<1x32xf32, #tpu.memory_space<vmem>>, vector<1x32xf32>
      %27 = vector.broadcast %26 : vector<1x32xf32> to vector<16x32xf32>
      %28 = arith.addf %25, %27 : vector<16x32xf32>
      %c0_22 = arith.constant 0 : index
      %c0_23 = arith.constant 0 : index
      %29 = vector.load %arg2[%c0_22, %c0_23] : memref<16x32xf32, #tpu.memory_space<vmem>>, vector<16x32xf32>
      %30 = arith.addf %28, %29 : vector<16x32xf32>
      %c0_24 = arith.constant 0 : index
      %c0_25 = arith.constant 0 : index
      %31 = vector.load %arg9[%c0_24, %c0_25] : memref<16x32xf32, #tpu.memory_space<vmem>>, vector<16x32xf32>
      tpu.vector_store %arg9[%c0_24, %c0_25], %30 {strides = array<i32>} : memref<16x32xf32, #tpu.memory_space<vmem>>, vector<16x32xf32>,
    } else {
    }
    return
  }
  func.func @transform_0(%arg0: i32, %arg1: i32) -> (i32, i32) {
    %c0_i32 = arith.constant 0 : i32
    %c0_i32_0 = arith.constant 0 : i32
    return %arg0, %c0_i32 : i32, i32
  }
  func.func @transform_1(%arg0: i32, %arg1: i32) -> (i32, i32) {
    %c0_i32 = arith.constant 0 : i32
    %c0_i32_0 = arith.constant 0 : i32
    %c0_i32_1 = arith.constant 0 : i32
    return %c0_i32, %c0_i32_0 : i32, i32
  }
  func.func @transform_2(%arg0: i32, %arg1: i32) -> (i32, i32) {
    %c0_i32 = arith.constant 0 : i32
    %c0_i32_0 = arith.constant 0 : i32
    %c0_i32_1 = arith.constant 0 : i32
    return %c0_i32, %c0_i32_0 : i32, i32
  }
  func.func @transform_3(%arg0: i32, %arg1: i32) -> (i32, i32) {
    %c0_i32 = arith.constant 0 : i32
    %c0_i32_0 = arith.constant 0 : i32
    return %c0_i32, %arg1 : i32, i32
  }
  func.func @transform_4(%arg0: i32, %arg1: i32) -> (i32, i32) {
    %c0_i32 = arith.constant 0 : i32
    %c0_i32_0 = arith.constant 0 : i32
    return %c0_i32, %arg1 : i32, i32
  }
  func.func @transform_5(%arg0: i32, %arg1: i32) -> (i32, i32) {
    %c0_i32 = arith.constant 0 : i32
    %c0_i32_0 = arith.constant 0 : i32
    return %arg1, %c0_i32 : i32, i32
  }
  func.func @transform_6(%arg0: i32, %arg1: i32) -> (i32, i32) {
    %c0_i32 = arith.constant 0 : i32
    %c0_i32_0 = arith.constant 0 : i32
    %c0_i32_1 = arith.constant 0 : i32
    return %c0_i32, %c0_i32_0 : i32, i32
  }
  func.func @transform_7(%arg0: i32, %arg1: i32) -> (i32, i32) {
    %c0_i32 = arith.constant 0 : i32
    %c0_i32_0 = arith.constant 0 : i32
    return %arg0, %c0_i32 : i32, i32
  }
}

module attributes {stable_mosaic.version = 11 : i64} {
  func.func @_mha_kernel(%arg0: i32, %arg1: i32, %arg2: i32, %arg3: memref<1x8x32xf32, #tpu.memory_space<vmem>>, %arg4: memref<1x8x32xf32, #tpu.memory_space<vmem>>, %arg5: memref<1x32xf32, #tpu.memory_space<vmem>>, %arg6: memref<1x32xf32, #tpu.memory_space<vmem>>, %arg7: memref<32x96xf32, #tpu.memory_space<vmem>>, %arg8: memref<1x32xf32, #tpu.memory_space<vmem>>, %arg9: memref<1x8x32xf32, #tpu.memory_space<vmem>>, %arg10: memref<1x4x8x8xf32, #tpu.memory_space<vmem>>, %arg11: memref<8x32xf32, #tpu.memory_space<vmem>>, %arg12: memref<1x8x32xf32, #tpu.memory_space<vmem>>, %arg13: memref<1x8x32xf32, #tpu.memory_space<vmem>>, %arg14: memref<1x8x32xf32, #tpu.memory_space<vmem>>) attributes {dimension_semantics = [#tpu.dimension_semantics<parallel>, #tpu.dimension_semantics<arbitrary>, #tpu.dimension_semantics<arbitrary>], iteration_bounds = array<i64: 2, 1, 1>, scalar_prefetch = 0 : i64, scratch_operands = 4 : i64, tpu.core_type = #tpu.core_type<tc>, window_params = [{transform_indices = @transform_0, window_bounds = array<i64: 1, 8, 32>}, {transform_indices = @transform_1, window_bounds = array<i64: 1, 8, 32>}, {pipeline_mode = #tpu.pipeline_mode<synchronous>, transform_indices = @transform_2, window_bounds = array<i64: 1, 32>}, {pipeline_mode = #tpu.pipeline_mode<synchronous>, transform_indices = @transform_3, window_bounds = array<i64: 1, 32>}, {pipeline_mode = #tpu.pipeline_mode<synchronous>, transform_indices = @transform_4, window_bounds = array<i64: 32, 96>}, {pipeline_mode = #tpu.pipeline_mode<synchronous>, transform_indices = @transform_5, window_bounds = array<i64: 1, 32>}, {transform_indices = @transform_6, window_bounds = array<i64: 1, 8, 32>}, {transform_indices = @transform_7, window_bounds = array<i64: 1, 4, 8, 8>}]} {
    %c0_i32 = arith.constant 0 : i32
    %0 = arith.cmpi eq, %arg1, %c0_i32 : i32
    %c0_i32_0 = arith.constant 0 : i32
    %1 = arith.cmpi eq, %arg2, %c0_i32_0 : i32
    %2 = arith.andi %0, %1 : i1
    %3 = arith.extui %2 : i1 to i32
    %c0_i32_1 = arith.constant 0 : i32
    %4 = arith.cmpi ne, %3, %c0_i32_1 : i32
    scf.if %4 {
      %c0_47 = arith.constant 0 : index
      %c0_48 = arith.constant 0 : index
      %c0_49 = arith.constant 0 : index
      %100 = vector.load %arg3[%c0_47, %c0_48, %c0_49] : memref<1x8x32xf32, #tpu.memory_space<vmem>>, vector<1x8x32xf32>
      %101 = vector.shape_cast %100 : vector<1x8x32xf32> to vector<8x32xf32>
      %c0_50 = arith.constant 0 : index
      %c0_51 = arith.constant 0 : index
      %102 = vector.load %arg5[%c0_50, %c0_51] : memref<1x32xf32, #tpu.memory_space<vmem>>, vector<1x32xf32>
      %c0_52 = arith.constant 0 : index
      %c0_53 = arith.constant 0 : index
      %103 = vector.load %arg6[%c0_52, %c0_53] : memref<1x32xf32, #tpu.memory_space<vmem>>, vector<1x32xf32>
      %cst_54 = arith.constant dense<0.000000e+00> : vector<8xf32>
      %104 = vector.multi_reduction <add>, %101, %cst_54 [1] : vector<8x32xf32> to vector<8xf32>
      %105 = vector.shape_cast %104 : vector<8xf32> to vector<8x1xf32>
      %cst_55 = arith.constant 3.200000e+01 : f32
      %106 = vector.broadcast %cst_55 : f32 to vector<8x1xf32>
      %107 = arith.divf %105, %106 : vector<8x1xf32>
      %108 = vector.broadcast %107 : vector<8x1xf32> to vector<8x32xf32>
      %109 = arith.subf %101, %108 : vector<8x32xf32>
      %110 = arith.mulf %109, %109 : vector<8x32xf32>
      %cst_56 = arith.constant dense<0.000000e+00> : vector<8xf32>
      %111 = vector.multi_reduction <add>, %110, %cst_56 [1] : vector<8x32xf32> to vector<8xf32>
      %112 = vector.shape_cast %111 : vector<8xf32> to vector<8x1xf32>
      %cst_57 = arith.constant 3.200000e+01 : f32
      %113 = vector.broadcast %cst_57 : f32 to vector<8x1xf32>
      %114 = arith.divf %112, %113 : vector<8x1xf32>
      %cst_58 = arith.constant 9.99999974E-6 : f32
      %115 = vector.broadcast %cst_58 : f32 to vector<8x1xf32>
      %116 = arith.addf %114, %115 : vector<8x1xf32>
      %117 = math.rsqrt %116 : vector<8x1xf32>
      %118 = vector.broadcast %117 : vector<8x1xf32> to vector<8x32xf32>
      %119 = arith.mulf %109, %118 : vector<8x32xf32>
      %120 = vector.broadcast %102 : vector<1x32xf32> to vector<8x32xf32>
      %121 = arith.mulf %119, %120 : vector<8x32xf32>
      %122 = vector.broadcast %103 : vector<1x32xf32> to vector<8x32xf32>
      %123 = arith.addf %121, %122 : vector<8x32xf32>
      %c0_59 = arith.constant 0 : index
      %c0_60 = arith.constant 0 : index
      %124 = vector.load %arg11[%c0_59, %c0_60] : memref<8x32xf32, #tpu.memory_space<vmem>>, vector<8x32xf32>
      tpu.vector_store %arg11[%c0_59, %c0_60], %123 {strides = array<i32>} : memref<8x32xf32, #tpu.memory_space<vmem>>, vector<8x32xf32>,
      %c0_61 = arith.constant 0 : index
      %c32 = arith.constant 32 : index
      %125 = vector.load %arg7[%c0_61, %c32] : memref<32x96xf32, #tpu.memory_space<vmem>>, vector<32x32xf32>
      %cst_62 = arith.constant dense<0.000000e+00> : vector<8x32xf32>
      %126 = tpu.matmul %123, %125, %cst_62 {dimension_numbers = #tpu.dot_dimension_numbers<[1], [0], [0], [1], [0, 0, 1, 1], [], []>} : vector<8x32xf32>, vector<32x32xf32>, vector<8x32xf32> -> vector<8x32xf32>
      %c0_63 = arith.constant 0 : index
      %c0_64 = arith.constant 0 : index
      %c0_65 = arith.constant 0 : index
      %127 = vector.load %arg12[%c0_63, %c0_64, %c0_65] : memref<1x8x32xf32, #tpu.memory_space<vmem>>, vector<1x8x32xf32>
      %128 = vector.shape_cast %127 : vector<1x8x32xf32> to vector<8x32xf32>
      %129 = vector.shape_cast %126 : vector<8x32xf32> to vector<1x8x32xf32>
      tpu.vector_store %arg12[%c0_63, %c0_64, %c0_65], %129 {strides = array<i32>} : memref<1x8x32xf32, #tpu.memory_space<vmem>>, vector<1x8x32xf32>,
      %c0_66 = arith.constant 0 : index
      %c64 = arith.constant 64 : index
      %130 = vector.load %arg7[%c0_66, %c64] : memref<32x96xf32, #tpu.memory_space<vmem>>, vector<32x32xf32>
      %cst_67 = arith.constant dense<0.000000e+00> : vector<8x32xf32>
      %131 = tpu.matmul %123, %130, %cst_67 {dimension_numbers = #tpu.dot_dimension_numbers<[1], [0], [0], [1], [0, 0, 1, 1], [], []>} : vector<8x32xf32>, vector<32x32xf32>, vector<8x32xf32> -> vector<8x32xf32>
      %c0_68 = arith.constant 0 : index
      %c0_69 = arith.constant 0 : index
      %132 = vector.load %arg8[%c0_68, %c0_69] : memref<1x32xf32, #tpu.memory_space<vmem>>, vector<1x32xf32>
      %133 = vector.broadcast %132 : vector<1x32xf32> to vector<8x32xf32>
      %134 = arith.addf %131, %133 : vector<8x32xf32>
      %c0_70 = arith.constant 0 : index
      %c0_71 = arith.constant 0 : index
      %c0_72 = arith.constant 0 : index
      %135 = vector.load %arg13[%c0_70, %c0_71, %c0_72] : memref<1x8x32xf32, #tpu.memory_space<vmem>>, vector<1x8x32xf32>
      %136 = vector.shape_cast %135 : vector<1x8x32xf32> to vector<8x32xf32>
      %137 = vector.shape_cast %134 : vector<8x32xf32> to vector<1x8x32xf32>
      tpu.vector_store %arg13[%c0_70, %c0_71, %c0_72], %137 {strides = array<i32>} : memref<1x8x32xf32, #tpu.memory_space<vmem>>, vector<1x8x32xf32>,
    } else {
    }
    %c0_i32_2 = arith.constant 0 : i32
    %5 = arith.cmpi eq, %arg2, %c0_i32_2 : i32
    %6 = arith.extui %5 : i1 to i32
    %c0_i32_3 = arith.constant 0 : i32
    %7 = arith.cmpi ne, %6, %c0_i32_3 : i32
    scf.if %7 {
      %c8_i32 = arith.constant 8 : i32
      %100 = arith.muli %arg1, %c8_i32 : i32
      %101 = tpu.assume_multiple %100, 8 : i32
      %102 = arith.index_cast %101 : i32 to index
      %c0_47 = arith.constant 0 : index
      %103 = vector.load %arg11[%102, %c0_47] : memref<8x32xf32, #tpu.memory_space<vmem>>, vector<8x32xf32>
      %c0_48 = arith.constant 0 : index
      %c0_49 = arith.constant 0 : index
      %104 = vector.load %arg7[%c0_48, %c0_49] : memref<32x96xf32, #tpu.memory_space<vmem>>, vector<32x32xf32>
      %cst_50 = arith.constant dense<0.000000e+00> : vector<8x32xf32>
      %105 = tpu.matmul %103, %104, %cst_50 {dimension_numbers = #tpu.dot_dimension_numbers<[1], [0], [0], [1], [0, 0, 1, 1], [], []>} : vector<8x32xf32>, vector<32x32xf32>, vector<8x32xf32> -> vector<8x32xf32>
      %c0_51 = arith.constant 0 : index
      %c0_52 = arith.constant 0 : index
      %c0_53 = arith.constant 0 : index
      %106 = vector.load %arg14[%c0_51, %c0_52, %c0_53] : memref<1x8x32xf32, #tpu.memory_space<vmem>>, vector<1x8x32xf32>
      %107 = vector.shape_cast %106 : vector<1x8x32xf32> to vector<8x32xf32>
      %108 = vector.shape_cast %105 : vector<8x32xf32> to vector<1x8x32xf32>
      tpu.vector_store %arg14[%c0_51, %c0_52, %c0_53], %108 {strides = array<i32>} : memref<1x8x32xf32, #tpu.memory_space<vmem>>, vector<1x8x32xf32>,
    } else {
    }
    %8 = arith.index_cast %arg2 : i32 to index
    %c0 = arith.constant 0 : index
    %c0_4 = arith.constant 0 : index
    %9 = vector.load %arg14[%8, %c0, %c0_4] : memref<1x8x32xf32, #tpu.memory_space<vmem>>, vector<1x8x32xf32>
    %10 = vector.shape_cast %9 : vector<1x8x32xf32> to vector<8x32xf32>
    %11 = arith.index_cast %arg2 : i32 to index
    %c0_5 = arith.constant 0 : index
    %c0_6 = arith.constant 0 : index
    %12 = vector.load %arg12[%11, %c0_5, %c0_6] : memref<1x8x32xf32, #tpu.memory_space<vmem>>, vector<1x8x32xf32>
    %13 = vector.shape_cast %12 : vector<1x8x32xf32> to vector<8x32xf32>
    %14 = arith.index_cast %arg2 : i32 to index
    %c0_7 = arith.constant 0 : index
    %c0_8 = arith.constant 0 : index
    %15 = vector.load %arg13[%14, %c0_7, %c0_8] : memref<1x8x32xf32, #tpu.memory_space<vmem>>, vector<1x8x32xf32>
    %16 = vector.shape_cast %15 : vector<1x8x32xf32> to vector<8x32xf32>
    %17 = vector.extract_strided_slice %10 {offsets = [0, 0], sizes = [8, 8], strides = [1, 1]} : vector<8x32xf32> to vector<8x8xf32>
    %18 = vector.extract_strided_slice %13 {offsets = [0, 0], sizes = [8, 8], strides = [1, 1]} : vector<8x32xf32> to vector<8x8xf32>
    %19 = vector.extract_strided_slice %16 {offsets = [0, 0], sizes = [8, 8], strides = [1, 1]} : vector<8x32xf32> to vector<8x8xf32>
    %cst = arith.constant dense<0.000000e+00> : vector<8x8xf32>
    %20 = tpu.matmul %17, %18, %cst {dimension_numbers = #tpu.dot_dimension_numbers<[1], [1], [0], [0], [0, 0, 1, 0], [], []>} : vector<8x8xf32>, vector<8x8xf32>, vector<8x8xf32> -> vector<8x8xf32>
    %cst_9 = arith.constant 0.353553385 : f32
    %21 = vector.broadcast %cst_9 : f32 to vector<8x8xf32>
    %22 = arith.mulf %20, %21 : vector<8x8xf32>
    %cst_10 = arith.constant dense<0xFF800000> : vector<8xf32>
    %23 = vector.multi_reduction <maximumf>, %22, %cst_10 [1] : vector<8x8xf32> to vector<8xf32>
    %24 = vector.shape_cast %23 : vector<8xf32> to vector<8x1xf32>
    %25 = vector.broadcast %24 : vector<8x1xf32> to vector<8x8xf32>
    %26 = arith.subf %22, %25 : vector<8x8xf32>
    %27 = math.exp %26 : vector<8x8xf32>
    %cst_11 = arith.constant dense<0.000000e+00> : vector<8xf32>
    %28 = vector.multi_reduction <add>, %27, %cst_11 [1] : vector<8x8xf32> to vector<8xf32>
    %29 = vector.shape_cast %28 : vector<8xf32> to vector<8x1xf32>
    %30 = vector.broadcast %29 : vector<8x1xf32> to vector<8x8xf32>
    %31 = arith.divf %27, %30 : vector<8x8xf32>
    %c0_12 = arith.constant 0 : index
    %c0_13 = arith.constant 0 : index
    %c0_14 = arith.constant 0 : index
    %c0_15 = arith.constant 0 : index
    %32 = vector.load %arg10[%c0_12, %c0_13, %c0_14, %c0_15] : memref<1x4x8x8xf32, #tpu.memory_space<vmem>>, vector<1x1x8x8xf32>
    %33 = vector.shape_cast %32 : vector<1x1x8x8xf32> to vector<8x8xf32>
    %34 = vector.shape_cast %31 : vector<8x8xf32> to vector<1x1x8x8xf32>
    tpu.vector_store %arg10[%c0_12, %c0_13, %c0_14, %c0_15], %34 {strides = array<i32>} : memref<1x4x8x8xf32, #tpu.memory_space<vmem>>, vector<1x1x8x8xf32>,
    %cst_16 = arith.constant dense<0.000000e+00> : vector<8x8xf32>
    %35 = tpu.matmul %31, %19, %cst_16 {dimension_numbers = #tpu.dot_dimension_numbers<[1], [0], [0], [1], [0, 0, 1, 1], [], []>} : vector<8x8xf32>, vector<8x8xf32>, vector<8x8xf32> -> vector<8x8xf32>
    %36 = vector.extract_strided_slice %10 {offsets = [0, 8], sizes = [8, 8], strides = [1, 1]} : vector<8x32xf32> to vector<8x8xf32>
    %37 = vector.extract_strided_slice %13 {offsets = [0, 8], sizes = [8, 8], strides = [1, 1]} : vector<8x32xf32> to vector<8x8xf32>
    %38 = vector.extract_strided_slice %16 {offsets = [0, 8], sizes = [8, 8], strides = [1, 1]} : vector<8x32xf32> to vector<8x8xf32>
    %cst_17 = arith.constant dense<0.000000e+00> : vector<8x8xf32>
    %39 = tpu.matmul %36, %37, %cst_17 {dimension_numbers = #tpu.dot_dimension_numbers<[1], [1], [0], [0], [0, 0, 1, 0], [], []>} : vector<8x8xf32>, vector<8x8xf32>, vector<8x8xf32> -> vector<8x8xf32>
    %cst_18 = arith.constant 0.353553385 : f32
    %40 = vector.broadcast %cst_18 : f32 to vector<8x8xf32>
    %41 = arith.mulf %39, %40 : vector<8x8xf32>
    %cst_19 = arith.constant dense<0xFF800000> : vector<8xf32>
    %42 = vector.multi_reduction <maximumf>, %41, %cst_19 [1] : vector<8x8xf32> to vector<8xf32>
    %43 = vector.shape_cast %42 : vector<8xf32> to vector<8x1xf32>
    %44 = vector.broadcast %43 : vector<8x1xf32> to vector<8x8xf32>
    %45 = arith.subf %41, %44 : vector<8x8xf32>
    %46 = math.exp %45 : vector<8x8xf32>
    %cst_20 = arith.constant dense<0.000000e+00> : vector<8xf32>
    %47 = vector.multi_reduction <add>, %46, %cst_20 [1] : vector<8x8xf32> to vector<8xf32>
    %48 = vector.shape_cast %47 : vector<8xf32> to vector<8x1xf32>
    %49 = vector.broadcast %48 : vector<8x1xf32> to vector<8x8xf32>
    %50 = arith.divf %46, %49 : vector<8x8xf32>
    %c0_21 = arith.constant 0 : index
    %c1 = arith.constant 1 : index
    %c0_22 = arith.constant 0 : index
    %c0_23 = arith.constant 0 : index
    %51 = vector.load %arg10[%c0_21, %c1, %c0_22, %c0_23] : memref<1x4x8x8xf32, #tpu.memory_space<vmem>>, vector<1x1x8x8xf32>
    %52 = vector.shape_cast %51 : vector<1x1x8x8xf32> to vector<8x8xf32>
    %53 = vector.shape_cast %50 : vector<8x8xf32> to vector<1x1x8x8xf32>
    tpu.vector_store %arg10[%c0_21, %c1, %c0_22, %c0_23], %53 {strides = array<i32>} : memref<1x4x8x8xf32, #tpu.memory_space<vmem>>, vector<1x1x8x8xf32>,
    %cst_24 = arith.constant dense<0.000000e+00> : vector<8x8xf32>
    %54 = tpu.matmul %50, %38, %cst_24 {dimension_numbers = #tpu.dot_dimension_numbers<[1], [0], [0], [1], [0, 0, 1, 1], [], []>} : vector<8x8xf32>, vector<8x8xf32>, vector<8x8xf32> -> vector<8x8xf32>
    %55 = vector.extract_strided_slice %10 {offsets = [0, 16], sizes = [8, 8], strides = [1, 1]} : vector<8x32xf32> to vector<8x8xf32>
    %56 = vector.extract_strided_slice %13 {offsets = [0, 16], sizes = [8, 8], strides = [1, 1]} : vector<8x32xf32> to vector<8x8xf32>
    %57 = vector.extract_strided_slice %16 {offsets = [0, 16], sizes = [8, 8], strides = [1, 1]} : vector<8x32xf32> to vector<8x8xf32>
    %cst_25 = arith.constant dense<0.000000e+00> : vector<8x8xf32>
    %58 = tpu.matmul %55, %56, %cst_25 {dimension_numbers = #tpu.dot_dimension_numbers<[1], [1], [0], [0], [0, 0, 1, 0], [], []>} : vector<8x8xf32>, vector<8x8xf32>, vector<8x8xf32> -> vector<8x8xf32>
    %cst_26 = arith.constant 0.353553385 : f32
    %59 = vector.broadcast %cst_26 : f32 to vector<8x8xf32>
    %60 = arith.mulf %58, %59 : vector<8x8xf32>
    %cst_27 = arith.constant dense<0xFF800000> : vector<8xf32>
    %61 = vector.multi_reduction <maximumf>, %60, %cst_27 [1] : vector<8x8xf32> to vector<8xf32>
    %62 = vector.shape_cast %61 : vector<8xf32> to vector<8x1xf32>
    %63 = vector.broadcast %62 : vector<8x1xf32> to vector<8x8xf32>
    %64 = arith.subf %60, %63 : vector<8x8xf32>
    %65 = math.exp %64 : vector<8x8xf32>
    %cst_28 = arith.constant dense<0.000000e+00> : vector<8xf32>
    %66 = vector.multi_reduction <add>, %65, %cst_28 [1] : vector<8x8xf32> to vector<8xf32>
    %67 = vector.shape_cast %66 : vector<8xf32> to vector<8x1xf32>
    %68 = vector.broadcast %67 : vector<8x1xf32> to vector<8x8xf32>
    %69 = arith.divf %65, %68 : vector<8x8xf32>
    %c0_29 = arith.constant 0 : index
    %c2 = arith.constant 2 : index
    %c0_30 = arith.constant 0 : index
    %c0_31 = arith.constant 0 : index
    %70 = vector.load %arg10[%c0_29, %c2, %c0_30, %c0_31] : memref<1x4x8x8xf32, #tpu.memory_space<vmem>>, vector<1x1x8x8xf32>
    %71 = vector.shape_cast %70 : vector<1x1x8x8xf32> to vector<8x8xf32>
    %72 = vector.shape_cast %69 : vector<8x8xf32> to vector<1x1x8x8xf32>
    tpu.vector_store %arg10[%c0_29, %c2, %c0_30, %c0_31], %72 {strides = array<i32>} : memref<1x4x8x8xf32, #tpu.memory_space<vmem>>, vector<1x1x8x8xf32>,
    %cst_32 = arith.constant dense<0.000000e+00> : vector<8x8xf32>
    %73 = tpu.matmul %69, %57, %cst_32 {dimension_numbers = #tpu.dot_dimension_numbers<[1], [0], [0], [1], [0, 0, 1, 1], [], []>} : vector<8x8xf32>, vector<8x8xf32>, vector<8x8xf32> -> vector<8x8xf32>
    %74 = vector.extract_strided_slice %10 {offsets = [0, 24], sizes = [8, 8], strides = [1, 1]} : vector<8x32xf32> to vector<8x8xf32>
    %75 = vector.extract_strided_slice %13 {offsets = [0, 24], sizes = [8, 8], strides = [1, 1]} : vector<8x32xf32> to vector<8x8xf32>
    %76 = vector.extract_strided_slice %16 {offsets = [0, 24], sizes = [8, 8], strides = [1, 1]} : vector<8x32xf32> to vector<8x8xf32>
    %cst_33 = arith.constant dense<0.000000e+00> : vector<8x8xf32>
    %77 = tpu.matmul %74, %75, %cst_33 {dimension_numbers = #tpu.dot_dimension_numbers<[1], [1], [0], [0], [0, 0, 1, 0], [], []>} : vector<8x8xf32>, vector<8x8xf32>, vector<8x8xf32> -> vector<8x8xf32>
    %cst_34 = arith.constant 0.353553385 : f32
    %78 = vector.broadcast %cst_34 : f32 to vector<8x8xf32>
    %79 = arith.mulf %77, %78 : vector<8x8xf32>
    %cst_35 = arith.constant dense<0xFF800000> : vector<8xf32>
    %80 = vector.multi_reduction <maximumf>, %79, %cst_35 [1] : vector<8x8xf32> to vector<8xf32>
    %81 = vector.shape_cast %80 : vector<8xf32> to vector<8x1xf32>
    %82 = vector.broadcast %81 : vector<8x1xf32> to vector<8x8xf32>
    %83 = arith.subf %79, %82 : vector<8x8xf32>
    %84 = math.exp %83 : vector<8x8xf32>
    %cst_36 = arith.constant dense<0.000000e+00> : vector<8xf32>
    %85 = vector.multi_reduction <add>, %84, %cst_36 [1] : vector<8x8xf32> to vector<8xf32>
    %86 = vector.shape_cast %85 : vector<8xf32> to vector<8x1xf32>
    %87 = vector.broadcast %86 : vector<8x1xf32> to vector<8x8xf32>
    %88 = arith.divf %84, %87 : vector<8x8xf32>
    %c0_37 = arith.constant 0 : index
    %c3 = arith.constant 3 : index
    %c0_38 = arith.constant 0 : index
    %c0_39 = arith.constant 0 : index
    %89 = vector.load %arg10[%c0_37, %c3, %c0_38, %c0_39] : memref<1x4x8x8xf32, #tpu.memory_space<vmem>>, vector<1x1x8x8xf32>
    %90 = vector.shape_cast %89 : vector<1x1x8x8xf32> to vector<8x8xf32>
    %91 = vector.shape_cast %88 : vector<8x8xf32> to vector<1x1x8x8xf32>
    tpu.vector_store %arg10[%c0_37, %c3, %c0_38, %c0_39], %91 {strides = array<i32>} : memref<1x4x8x8xf32, #tpu.memory_space<vmem>>, vector<1x1x8x8xf32>,
    %cst_40 = arith.constant dense<0.000000e+00> : vector<8x8xf32>
    %92 = tpu.matmul %88, %76, %cst_40 {dimension_numbers = #tpu.dot_dimension_numbers<[1], [0], [0], [1], [0, 0, 1, 1], [], []>} : vector<8x8xf32>, vector<8x8xf32>, vector<8x8xf32> -> vector<8x8xf32>
    %93 = tpu.concatenate %35, %54, %73, %92 in 1 : vector<8x8xf32>, vector<8x8xf32>, vector<8x8xf32>, vector<8x8xf32> -> vector<8x32xf32>
    %c0_41 = arith.constant 0 : index
    %c0_42 = arith.constant 0 : index
    %c0_43 = arith.constant 0 : index
    %94 = vector.load %arg4[%c0_41, %c0_42, %c0_43] : memref<1x8x32xf32, #tpu.memory_space<vmem>>, vector<1x8x32xf32>
    %95 = vector.shape_cast %94 : vector<1x8x32xf32> to vector<8x32xf32>
    %96 = arith.addf %93, %95 : vector<8x32xf32>
    %c0_44 = arith.constant 0 : index
    %c0_45 = arith.constant 0 : index
    %c0_46 = arith.constant 0 : index
    %97 = vector.load %arg9[%c0_44, %c0_45, %c0_46] : memref<1x8x32xf32, #tpu.memory_space<vmem>>, vector<1x8x32xf32>
    %98 = vector.shape_cast %97 : vector<1x8x32xf32> to vector<8x32xf32>
    %99 = vector.shape_cast %96 : vector<8x32xf32> to vector<1x8x32xf32>
    tpu.vector_store %arg9[%c0_44, %c0_45, %c0_46], %99 {strides = array<i32>} : memref<1x8x32xf32, #tpu.memory_space<vmem>>, vector<1x8x32xf32>,
    return
  }
  func.func @transform_0(%arg0: i32, %arg1: i32, %arg2: i32) -> (i32, i32, i32) {
    %c0_i32 = arith.constant 0 : i32
    %c0_i32_0 = arith.constant 0 : i32
    %c0_i32_1 = arith.constant 0 : i32
    return %arg0, %c0_i32, %c0_i32_0 : i32, i32, i32
  }
  func.func @transform_1(%arg0: i32, %arg1: i32, %arg2: i32) -> (i32, i32, i32) {
    %c0_i32 = arith.constant 0 : i32
    return %arg0, %arg1, %arg2 : i32, i32, i32
  }
  func.func @transform_2(%arg0: i32, %arg1: i32, %arg2: i32) -> (i32, i32) {
    %c0_i32 = arith.constant 0 : i32
    %c0_i32_0 = arith.constant 0 : i32
    %c0_i32_1 = arith.constant 0 : i32
    return %c0_i32, %c0_i32_0 : i32, i32
  }
  func.func @transform_3(%arg0: i32, %arg1: i32, %arg2: i32) -> (i32, i32) {
    %c0_i32 = arith.constant 0 : i32
    %c0_i32_0 = arith.constant 0 : i32
    %c0_i32_1 = arith.constant 0 : i32
    return %c0_i32, %c0_i32_0 : i32, i32
  }
  func.func @transform_4(%arg0: i32, %arg1: i32, %arg2: i32) -> (i32, i32) {
    %c0_i32 = arith.constant 0 : i32
    %c0_i32_0 = arith.constant 0 : i32
    %c0_i32_1 = arith.constant 0 : i32
    return %c0_i32, %c0_i32_0 : i32, i32
  }
  func.func @transform_5(%arg0: i32, %arg1: i32, %arg2: i32) -> (i32, i32) {
    %c0_i32 = arith.constant 0 : i32
    %c0_i32_0 = arith.constant 0 : i32
    %c0_i32_1 = arith.constant 0 : i32
    return %c0_i32, %c0_i32_0 : i32, i32
  }
  func.func @transform_6(%arg0: i32, %arg1: i32, %arg2: i32) -> (i32, i32, i32) {
    %c0_i32 = arith.constant 0 : i32
    return %arg0, %arg1, %arg2 : i32, i32, i32
  }
  func.func @transform_7(%arg0: i32, %arg1: i32, %arg2: i32) -> (i32, i32, i32, i32) {
    %c0_i32 = arith.constant 0 : i32
    %c0_i32_0 = arith.constant 0 : i32
    return %arg0, %arg2, %arg1, %c0_i32 : i32, i32, i32, i32
  }
}

module attributes {stable_mosaic.version = 11 : i64} {
  func.func @_ffn_kernel(%arg0: i32, %arg1: i32, %arg2: memref<16x32xf32, #tpu.memory_space<vmem>>, %arg3: memref<1x32xf32, #tpu.memory_space<vmem>>, %arg4: memref<1x32xf32, #tpu.memory_space<vmem>>, %arg5: memref<32x128xf32, #tpu.memory_space<vmem>>, %arg6: memref<1x128xf32, #tpu.memory_space<vmem>>, %arg7: memref<128x32xf32, #tpu.memory_space<vmem>>, %arg8: memref<1x32xf32, #tpu.memory_space<vmem>>, %arg9: memref<16x32xf32, #tpu.memory_space<vmem>>, %arg10: memref<16x32xf32, #tpu.memory_space<vmem>>, %arg11: memref<16x32xf32, #tpu.memory_space<vmem>>) attributes {dimension_semantics = [#tpu.dimension_semantics<parallel>, #tpu.dimension_semantics<arbitrary>], iteration_bounds = array<i64: 1, 1>, scalar_prefetch = 0 : i64, scratch_operands = 2 : i64, tpu.core_type = #tpu.core_type<tc>, window_params = [{transform_indices = @transform_0, window_bounds = array<i64: 16, 32>}, {pipeline_mode = #tpu.pipeline_mode<synchronous>, transform_indices = @transform_1, window_bounds = array<i64: 1, 32>}, {pipeline_mode = #tpu.pipeline_mode<synchronous>, transform_indices = @transform_2, window_bounds = array<i64: 1, 32>}, {transform_indices = @transform_3, window_bounds = array<i64: 32, 128>}, {transform_indices = @transform_4, window_bounds = array<i64: 1, 128>}, {transform_indices = @transform_5, window_bounds = array<i64: 128, 32>}, {pipeline_mode = #tpu.pipeline_mode<synchronous>, transform_indices = @transform_6, window_bounds = array<i64: 1, 32>}, {transform_indices = @transform_7, window_bounds = array<i64: 16, 32>}]} {
    %c0_i32 = arith.constant 0 : i32
    %0 = arith.cmpi eq, %arg1, %c0_i32 : i32
    %1 = arith.extui %0 : i1 to i32
    %c0_i32_0 = arith.constant 0 : i32
    %2 = arith.cmpi ne, %1, %c0_i32_0 : i32
    scf.if %2 {
      %c0_18 = arith.constant 0 : index
      %c0_19 = arith.constant 0 : index
      %25 = vector.load %arg2[%c0_18, %c0_19] : memref<16x32xf32, #tpu.memory_space<vmem>>, vector<16x32xf32>
      %c0_20 = arith.constant 0 : index
      %c0_21 = arith.constant 0 : index
      %26 = vector.load %arg3[%c0_20, %c0_21] : memref<1x32xf32, #tpu.memory_space<vmem>>, vector<1x32xf32>
      %c0_22 = arith.constant 0 : index
      %c0_23 = arith.constant 0 : index
      %27 = vector.load %arg4[%c0_22, %c0_23] : memref<1x32xf32, #tpu.memory_space<vmem>>, vector<1x32xf32>
      %cst_24 = arith.constant dense<0.000000e+00> : vector<16xf32>
      %28 = vector.multi_reduction <add>, %25, %cst_24 [1] : vector<16x32xf32> to vector<16xf32>
      %29 = vector.shape_cast %28 : vector<16xf32> to vector<16x1xf32>
      %cst_25 = arith.constant 3.200000e+01 : f32
      %30 = vector.broadcast %cst_25 : f32 to vector<16x1xf32>
      %31 = arith.divf %29, %30 : vector<16x1xf32>
      %32 = vector.broadcast %31 : vector<16x1xf32> to vector<16x32xf32>
      %33 = arith.subf %25, %32 : vector<16x32xf32>
      %34 = arith.mulf %33, %33 : vector<16x32xf32>
      %cst_26 = arith.constant dense<0.000000e+00> : vector<16xf32>
      %35 = vector.multi_reduction <add>, %34, %cst_26 [1] : vector<16x32xf32> to vector<16xf32>
      %36 = vector.shape_cast %35 : vector<16xf32> to vector<16x1xf32>
      %cst_27 = arith.constant 3.200000e+01 : f32
      %37 = vector.broadcast %cst_27 : f32 to vector<16x1xf32>
      %38 = arith.divf %36, %37 : vector<16x1xf32>
      %cst_28 = arith.constant 9.99999974E-6 : f32
      %39 = vector.broadcast %cst_28 : f32 to vector<16x1xf32>
      %40 = arith.addf %38, %39 : vector<16x1xf32>
      %41 = math.rsqrt %40 : vector<16x1xf32>
      %42 = vector.broadcast %41 : vector<16x1xf32> to vector<16x32xf32>
      %43 = arith.mulf %33, %42 : vector<16x32xf32>
      %44 = vector.broadcast %26 : vector<1x32xf32> to vector<16x32xf32>
      %45 = arith.mulf %43, %44 : vector<16x32xf32>
      %46 = vector.broadcast %27 : vector<1x32xf32> to vector<16x32xf32>
      %47 = arith.addf %45, %46 : vector<16x32xf32>
      %c0_29 = arith.constant 0 : index
      %c0_30 = arith.constant 0 : index
      %48 = vector.load %arg10[%c0_29, %c0_30] : memref<16x32xf32, #tpu.memory_space<vmem>>, vector<16x32xf32>
      tpu.vector_store %arg10[%c0_29, %c0_30], %47 {strides = array<i32>} : memref<16x32xf32, #tpu.memory_space<vmem>>, vector<16x32xf32>,
      %cst_31 = arith.constant 0.000000e+00 : f32
      %49 = vector.broadcast %cst_31 : f32 to vector<16x32xf32>
      %c0_32 = arith.constant 0 : index
      %c0_33 = arith.constant 0 : index
      %50 = vector.load %arg11[%c0_32, %c0_33] : memref<16x32xf32, #tpu.memory_space<vmem>>, vector<16x32xf32>
      tpu.vector_store %arg11[%c0_32, %c0_33], %49 {strides = array<i32>} : memref<16x32xf32, #tpu.memory_space<vmem>>, vector<16x32xf32>,
    } else {
    }
    %c0 = arith.constant 0 : index
    %c0_1 = arith.constant 0 : index
    %3 = vector.load %arg10[%c0, %c0_1] : memref<16x32xf32, #tpu.memory_space<vmem>>, vector<16x32xf32>
    %c0_2 = arith.constant 0 : index
    %c0_3 = arith.constant 0 : index
    %4 = vector.load %arg5[%c0_2, %c0_3] : memref<32x128xf32, #tpu.memory_space<vmem>>, vector<32x128xf32>
    %cst = arith.constant dense<0.000000e+00> : vector<16x128xf32>
    %5 = tpu.matmul %3, %4, %cst {dimension_numbers = #tpu.dot_dimension_numbers<[1], [0], [0], [1], [0, 0, 1, 1], [], []>} : vector<16x32xf32>, vector<32x128xf32>, vector<16x128xf32> -> vector<16x128xf32>
    %c0_4 = arith.constant 0 : index
    %c0_5 = arith.constant 0 : index
    %6 = vector.load %arg6[%c0_4, %c0_5] : memref<1x128xf32, #tpu.memory_space<vmem>>, vector<1x128xf32>
    %7 = vector.broadcast %6 : vector<1x128xf32> to vector<16x128xf32>
    %8 = arith.addf %5, %7 : vector<16x128xf32>
    %cst_6 = arith.constant 5.000000e-01 : f32
    %9 = vector.broadcast %cst_6 : f32 to vector<16x128xf32>
    %10 = arith.mulf %9, %8 : vector<16x128xf32>
    %cst_7 = arith.constant 0.707106769 : f32
    %11 = vector.broadcast %cst_7 : f32 to vector<16x128xf32>
    %12 = arith.mulf %8, %11 : vector<16x128xf32>
    %13 = math.erf %12 : vector<16x128xf32>
    %cst_8 = arith.constant 1.000000e+00 : f32
    %14 = vector.broadcast %cst_8 : f32 to vector<16x128xf32>
    %15 = arith.addf %14, %13 : vector<16x128xf32>
    %16 = arith.mulf %10, %15 : vector<16x128xf32>
    %c0_9 = arith.constant 0 : index
    %c0_10 = arith.constant 0 : index
    %17 = vector.load %arg11[%c0_9, %c0_10] : memref<16x32xf32, #tpu.memory_space<vmem>>, vector<16x32xf32>
    %c0_11 = arith.constant 0 : index
    %c0_12 = arith.constant 0 : index
    %18 = vector.load %arg7[%c0_11, %c0_12] : memref<128x32xf32, #tpu.memory_space<vmem>>, vector<128x32xf32>
    %cst_13 = arith.constant dense<0.000000e+00> : vector<16x32xf32>
    %19 = tpu.matmul %16, %18, %cst_13 {dimension_numbers = #tpu.dot_dimension_numbers<[1], [0], [0], [1], [0, 0, 1, 1], [], []>} : vector<16x128xf32>, vector<128x32xf32>, vector<16x32xf32> -> vector<16x32xf32>
    %20 = arith.addf %17, %19 : vector<16x32xf32>
    %c0_14 = arith.constant 0 : index
    %c0_15 = arith.constant 0 : index
    %21 = vector.load %arg11[%c0_14, %c0_15] : memref<16x32xf32, #tpu.memory_space<vmem>>, vector<16x32xf32>
    tpu.vector_store %arg11[%c0_14, %c0_15], %20 {strides = array<i32>} : memref<16x32xf32, #tpu.memory_space<vmem>>, vector<16x32xf32>,
    %c0_i32_16 = arith.constant 0 : i32
    %22 = arith.cmpi eq, %arg1, %c0_i32_16 : i32
    %23 = arith.extui %22 : i1 to i32
    %c0_i32_17 = arith.constant 0 : i32
    %24 = arith.cmpi ne, %23, %c0_i32_17 : i32
    scf.if %24 {
      %c0_18 = arith.constant 0 : index
      %c0_19 = arith.constant 0 : index
      %25 = vector.load %arg11[%c0_18, %c0_19] : memref<16x32xf32, #tpu.memory_space<vmem>>, vector<16x32xf32>
      %c0_20 = arith.constant 0 : index
      %c0_21 = arith.constant 0 : index
      %26 = vector.load %arg8[%c0_20, %c0_21] : memref<1x32xf32, #tpu.memory_space<vmem>>, vector<1x32xf32>
      %27 = vector.broadcast %26 : vector<1x32xf32> to vector<16x32xf32>
      %28 = arith.addf %25, %27 : vector<16x32xf32>
      %c0_22 = arith.constant 0 : index
      %c0_23 = arith.constant 0 : index
      %29 = vector.load %arg2[%c0_22, %c0_23] : memref<16x32xf32, #tpu.memory_space<vmem>>, vector<16x32xf32>
      %30 = arith.addf %28, %29 : vector<16x32xf32>
      %c0_24 = arith.constant 0 : index
      %c0_25 = arith.constant 0 : index
      %31 = vector.load %arg9[%c0_24, %c0_25] : memref<16x32xf32, #tpu.memory_space<vmem>>, vector<16x32xf32>
      tpu.vector_store %arg9[%c0_24, %c0_25], %30 {strides = array<i32>} : memref<16x32xf32, #tpu.memory_space<vmem>>, vector<16x32xf32>,
    } else {
    }
    return
  }
  func.func @transform_0(%arg0: i32, %arg1: i32) -> (i32, i32) {
    %c0_i32 = arith.constant 0 : i32
    %c0_i32_0 = arith.constant 0 : i32
    return %arg0, %c0_i32 : i32, i32
  }
  func.func @transform_1(%arg0: i32, %arg1: i32) -> (i32, i32) {
    %c0_i32 = arith.constant 0 : i32
    %c0_i32_0 = arith.constant 0 : i32
    %c0_i32_1 = arith.constant 0 : i32
    return %c0_i32, %c0_i32_0 : i32, i32
  }
  func.func @transform_2(%arg0: i32, %arg1: i32) -> (i32, i32) {
    %c0_i32 = arith.constant 0 : i32
    %c0_i32_0 = arith.constant 0 : i32
    %c0_i32_1 = arith.constant 0 : i32
    return %c0_i32, %c0_i32_0 : i32, i32
  }
  func.func @transform_3(%arg0: i32, %arg1: i32) -> (i32, i32) {
    %c0_i32 = arith.constant 0 : i32
    %c0_i32_0 = arith.constant 0 : i32
    return %c0_i32, %arg1 : i32, i32
  }
  func.func @transform_4(%arg0: i32, %arg1: i32) -> (i32, i32) {
    %c0_i32 = arith.constant 0 : i32
    %c0_i32_0 = arith.constant 0 : i32
    return %c0_i32, %arg1 : i32, i32
  }
  func.func @transform_5(%arg0: i32, %arg1: i32) -> (i32, i32) {
    %c0_i32 = arith.constant 0 : i32
    %c0_i32_0 = arith.constant 0 : i32
    return %arg1, %c0_i32 : i32, i32
  }
  func.func @transform_6(%arg0: i32, %arg1: i32) -> (i32, i32) {
    %c0_i32 = arith.constant 0 : i32
    %c0_i32_0 = arith.constant 0 : i32
    %c0_i32_1 = arith.constant 0 : i32
    return %c0_i32, %c0_i32_0 : i32, i32
  }
  func.func @transform_7(%arg0: i32, %arg1: i32) -> (i32, i32) {
    %c0_i32 = arith.constant 0 : i32
    %c0_i32_0 = arith.constant 0 : i32
    return %arg0, %c0_i32 : i32, i32
  }
}

module attributes {stable_mosaic.version = 11 : i64} {
  func.func @_mha_kernel(%arg0: i32, %arg1: i32, %arg2: i32, %arg3: memref<1x8x32xf32, #tpu.memory_space<vmem>>, %arg4: memref<1x8x32xf32, #tpu.memory_space<vmem>>, %arg5: memref<1x32xf32, #tpu.memory_space<vmem>>, %arg6: memref<1x32xf32, #tpu.memory_space<vmem>>, %arg7: memref<32x96xf32, #tpu.memory_space<vmem>>, %arg8: memref<1x32xf32, #tpu.memory_space<vmem>>, %arg9: memref<1x8x32xf32, #tpu.memory_space<vmem>>, %arg10: memref<1x4x8x8xf32, #tpu.memory_space<vmem>>, %arg11: memref<8x32xf32, #tpu.memory_space<vmem>>, %arg12: memref<1x8x32xf32, #tpu.memory_space<vmem>>, %arg13: memref<1x8x32xf32, #tpu.memory_space<vmem>>, %arg14: memref<1x8x32xf32, #tpu.memory_space<vmem>>) attributes {dimension_semantics = [#tpu.dimension_semantics<parallel>, #tpu.dimension_semantics<arbitrary>, #tpu.dimension_semantics<arbitrary>], iteration_bounds = array<i64: 2, 1, 1>, scalar_prefetch = 0 : i64, scratch_operands = 4 : i64, tpu.core_type = #tpu.core_type<tc>, window_params = [{transform_indices = @transform_0, window_bounds = array<i64: 1, 8, 32>}, {transform_indices = @transform_1, window_bounds = array<i64: 1, 8, 32>}, {pipeline_mode = #tpu.pipeline_mode<synchronous>, transform_indices = @transform_2, window_bounds = array<i64: 1, 32>}, {pipeline_mode = #tpu.pipeline_mode<synchronous>, transform_indices = @transform_3, window_bounds = array<i64: 1, 32>}, {pipeline_mode = #tpu.pipeline_mode<synchronous>, transform_indices = @transform_4, window_bounds = array<i64: 32, 96>}, {pipeline_mode = #tpu.pipeline_mode<synchronous>, transform_indices = @transform_5, window_bounds = array<i64: 1, 32>}, {transform_indices = @transform_6, window_bounds = array<i64: 1, 8, 32>}, {transform_indices = @transform_7, window_bounds = array<i64: 1, 4, 8, 8>}]} {
    %c0_i32 = arith.constant 0 : i32
    %0 = arith.cmpi eq, %arg1, %c0_i32 : i32
    %c0_i32_0 = arith.constant 0 : i32
    %1 = arith.cmpi eq, %arg2, %c0_i32_0 : i32
    %2 = arith.andi %0, %1 : i1
    %3 = arith.extui %2 : i1 to i32
    %c0_i32_1 = arith.constant 0 : i32
    %4 = arith.cmpi ne, %3, %c0_i32_1 : i32
    scf.if %4 {
      %c0_47 = arith.constant 0 : index
      %c0_48 = arith.constant 0 : index
      %c0_49 = arith.constant 0 : index
      %100 = vector.load %arg3[%c0_47, %c0_48, %c0_49] : memref<1x8x32xf32, #tpu.memory_space<vmem>>, vector<1x8x32xf32>
      %101 = vector.shape_cast %100 : vector<1x8x32xf32> to vector<8x32xf32>
      %c0_50 = arith.constant 0 : index
      %c0_51 = arith.constant 0 : index
      %102 = vector.load %arg5[%c0_50, %c0_51] : memref<1x32xf32, #tpu.memory_space<vmem>>, vector<1x32xf32>
      %c0_52 = arith.constant 0 : index
      %c0_53 = arith.constant 0 : index
      %103 = vector.load %arg6[%c0_52, %c0_53] : memref<1x32xf32, #tpu.memory_space<vmem>>, vector<1x32xf32>
      %cst_54 = arith.constant dense<0.000000e+00> : vector<8xf32>
      %104 = vector.multi_reduction <add>, %101, %cst_54 [1] : vector<8x32xf32> to vector<8xf32>
      %105 = vector.shape_cast %104 : vector<8xf32> to vector<8x1xf32>
      %cst_55 = arith.constant 3.200000e+01 : f32
      %106 = vector.broadcast %cst_55 : f32 to vector<8x1xf32>
      %107 = arith.divf %105, %106 : vector<8x1xf32>
      %108 = vector.broadcast %107 : vector<8x1xf32> to vector<8x32xf32>
      %109 = arith.subf %101, %108 : vector<8x32xf32>
      %110 = arith.mulf %109, %109 : vector<8x32xf32>
      %cst_56 = arith.constant dense<0.000000e+00> : vector<8xf32>
      %111 = vector.multi_reduction <add>, %110, %cst_56 [1] : vector<8x32xf32> to vector<8xf32>
      %112 = vector.shape_cast %111 : vector<8xf32> to vector<8x1xf32>
      %cst_57 = arith.constant 3.200000e+01 : f32
      %113 = vector.broadcast %cst_57 : f32 to vector<8x1xf32>
      %114 = arith.divf %112, %113 : vector<8x1xf32>
      %cst_58 = arith.constant 9.99999974E-6 : f32
      %115 = vector.broadcast %cst_58 : f32 to vector<8x1xf32>
      %116 = arith.addf %114, %115 : vector<8x1xf32>
      %117 = math.rsqrt %116 : vector<8x1xf32>
      %118 = vector.broadcast %117 : vector<8x1xf32> to vector<8x32xf32>
      %119 = arith.mulf %109, %118 : vector<8x32xf32>
      %120 = vector.broadcast %102 : vector<1x32xf32> to vector<8x32xf32>
      %121 = arith.mulf %119, %120 : vector<8x32xf32>
      %122 = vector.broadcast %103 : vector<1x32xf32> to vector<8x32xf32>
      %123 = arith.addf %121, %122 : vector<8x32xf32>
      %c0_59 = arith.constant 0 : index
      %c0_60 = arith.constant 0 : index
      %124 = vector.load %arg11[%c0_59, %c0_60] : memref<8x32xf32, #tpu.memory_space<vmem>>, vector<8x32xf32>
      tpu.vector_store %arg11[%c0_59, %c0_60], %123 {strides = array<i32>} : memref<8x32xf32, #tpu.memory_space<vmem>>, vector<8x32xf32>,
      %c0_61 = arith.constant 0 : index
      %c32 = arith.constant 32 : index
      %125 = vector.load %arg7[%c0_61, %c32] : memref<32x96xf32, #tpu.memory_space<vmem>>, vector<32x32xf32>
      %cst_62 = arith.constant dense<0.000000e+00> : vector<8x32xf32>
      %126 = tpu.matmul %123, %125, %cst_62 {dimension_numbers = #tpu.dot_dimension_numbers<[1], [0], [0], [1], [0, 0, 1, 1], [], []>} : vector<8x32xf32>, vector<32x32xf32>, vector<8x32xf32> -> vector<8x32xf32>
      %c0_63 = arith.constant 0 : index
      %c0_64 = arith.constant 0 : index
      %c0_65 = arith.constant 0 : index
      %127 = vector.load %arg12[%c0_63, %c0_64, %c0_65] : memref<1x8x32xf32, #tpu.memory_space<vmem>>, vector<1x8x32xf32>
      %128 = vector.shape_cast %127 : vector<1x8x32xf32> to vector<8x32xf32>
      %129 = vector.shape_cast %126 : vector<8x32xf32> to vector<1x8x32xf32>
      tpu.vector_store %arg12[%c0_63, %c0_64, %c0_65], %129 {strides = array<i32>} : memref<1x8x32xf32, #tpu.memory_space<vmem>>, vector<1x8x32xf32>,
      %c0_66 = arith.constant 0 : index
      %c64 = arith.constant 64 : index
      %130 = vector.load %arg7[%c0_66, %c64] : memref<32x96xf32, #tpu.memory_space<vmem>>, vector<32x32xf32>
      %cst_67 = arith.constant dense<0.000000e+00> : vector<8x32xf32>
      %131 = tpu.matmul %123, %130, %cst_67 {dimension_numbers = #tpu.dot_dimension_numbers<[1], [0], [0], [1], [0, 0, 1, 1], [], []>} : vector<8x32xf32>, vector<32x32xf32>, vector<8x32xf32> -> vector<8x32xf32>
      %c0_68 = arith.constant 0 : index
      %c0_69 = arith.constant 0 : index
      %132 = vector.load %arg8[%c0_68, %c0_69] : memref<1x32xf32, #tpu.memory_space<vmem>>, vector<1x32xf32>
      %133 = vector.broadcast %132 : vector<1x32xf32> to vector<8x32xf32>
      %134 = arith.addf %131, %133 : vector<8x32xf32>
      %c0_70 = arith.constant 0 : index
      %c0_71 = arith.constant 0 : index
      %c0_72 = arith.constant 0 : index
      %135 = vector.load %arg13[%c0_70, %c0_71, %c0_72] : memref<1x8x32xf32, #tpu.memory_space<vmem>>, vector<1x8x32xf32>
      %136 = vector.shape_cast %135 : vector<1x8x32xf32> to vector<8x32xf32>
      %137 = vector.shape_cast %134 : vector<8x32xf32> to vector<1x8x32xf32>
      tpu.vector_store %arg13[%c0_70, %c0_71, %c0_72], %137 {strides = array<i32>} : memref<1x8x32xf32, #tpu.memory_space<vmem>>, vector<1x8x32xf32>,
    } else {
    }
    %c0_i32_2 = arith.constant 0 : i32
    %5 = arith.cmpi eq, %arg2, %c0_i32_2 : i32
    %6 = arith.extui %5 : i1 to i32
    %c0_i32_3 = arith.constant 0 : i32
    %7 = arith.cmpi ne, %6, %c0_i32_3 : i32
    scf.if %7 {
      %c8_i32 = arith.constant 8 : i32
      %100 = arith.muli %arg1, %c8_i32 : i32
      %101 = tpu.assume_multiple %100, 8 : i32
      %102 = arith.index_cast %101 : i32 to index
      %c0_47 = arith.constant 0 : index
      %103 = vector.load %arg11[%102, %c0_47] : memref<8x32xf32, #tpu.memory_space<vmem>>, vector<8x32xf32>
      %c0_48 = arith.constant 0 : index
      %c0_49 = arith.constant 0 : index
      %104 = vector.load %arg7[%c0_48, %c0_49] : memref<32x96xf32, #tpu.memory_space<vmem>>, vector<32x32xf32>
      %cst_50 = arith.constant dense<0.000000e+00> : vector<8x32xf32>
      %105 = tpu.matmul %103, %104, %cst_50 {dimension_numbers = #tpu.dot_dimension_numbers<[1], [0], [0], [1], [0, 0, 1, 1], [], []>} : vector<8x32xf32>, vector<32x32xf32>, vector<8x32xf32> -> vector<8x32xf32>
      %c0_51 = arith.constant 0 : index
      %c0_52 = arith.constant 0 : index
      %c0_53 = arith.constant 0 : index
      %106 = vector.load %arg14[%c0_51, %c0_52, %c0_53] : memref<1x8x32xf32, #tpu.memory_space<vmem>>, vector<1x8x32xf32>
      %107 = vector.shape_cast %106 : vector<1x8x32xf32> to vector<8x32xf32>
      %108 = vector.shape_cast %105 : vector<8x32xf32> to vector<1x8x32xf32>
      tpu.vector_store %arg14[%c0_51, %c0_52, %c0_53], %108 {strides = array<i32>} : memref<1x8x32xf32, #tpu.memory_space<vmem>>, vector<1x8x32xf32>,
    } else {
    }
    %8 = arith.index_cast %arg2 : i32 to index
    %c0 = arith.constant 0 : index
    %c0_4 = arith.constant 0 : index
    %9 = vector.load %arg14[%8, %c0, %c0_4] : memref<1x8x32xf32, #tpu.memory_space<vmem>>, vector<1x8x32xf32>
    %10 = vector.shape_cast %9 : vector<1x8x32xf32> to vector<8x32xf32>
    %11 = arith.index_cast %arg2 : i32 to index
    %c0_5 = arith.constant 0 : index
    %c0_6 = arith.constant 0 : index
    %12 = vector.load %arg12[%11, %c0_5, %c0_6] : memref<1x8x32xf32, #tpu.memory_space<vmem>>, vector<1x8x32xf32>
    %13 = vector.shape_cast %12 : vector<1x8x32xf32> to vector<8x32xf32>
    %14 = arith.index_cast %arg2 : i32 to index
    %c0_7 = arith.constant 0 : index
    %c0_8 = arith.constant 0 : index
    %15 = vector.load %arg13[%14, %c0_7, %c0_8] : memref<1x8x32xf32, #tpu.memory_space<vmem>>, vector<1x8x32xf32>
    %16 = vector.shape_cast %15 : vector<1x8x32xf32> to vector<8x32xf32>
    %17 = vector.extract_strided_slice %10 {offsets = [0, 0], sizes = [8, 8], strides = [1, 1]} : vector<8x32xf32> to vector<8x8xf32>
    %18 = vector.extract_strided_slice %13 {offsets = [0, 0], sizes = [8, 8], strides = [1, 1]} : vector<8x32xf32> to vector<8x8xf32>
    %19 = vector.extract_strided_slice %16 {offsets = [0, 0], sizes = [8, 8], strides = [1, 1]} : vector<8x32xf32> to vector<8x8xf32>
    %cst = arith.constant dense<0.000000e+00> : vector<8x8xf32>
    %20 = tpu.matmul %17, %18, %cst {dimension_numbers = #tpu.dot_dimension_numbers<[1], [1], [0], [0], [0, 0, 1, 0], [], []>} : vector<8x8xf32>, vector<8x8xf32>, vector<8x8xf32> -> vector<8x8xf32>
    %cst_9 = arith.constant 0.353553385 : f32
    %21 = vector.broadcast %cst_9 : f32 to vector<8x8xf32>
    %22 = arith.mulf %20, %21 : vector<8x8xf32>
    %cst_10 = arith.constant dense<0xFF800000> : vector<8xf32>
    %23 = vector.multi_reduction <maximumf>, %22, %cst_10 [1] : vector<8x8xf32> to vector<8xf32>
    %24 = vector.shape_cast %23 : vector<8xf32> to vector<8x1xf32>
    %25 = vector.broadcast %24 : vector<8x1xf32> to vector<8x8xf32>
    %26 = arith.subf %22, %25 : vector<8x8xf32>
    %27 = math.exp %26 : vector<8x8xf32>
    %cst_11 = arith.constant dense<0.000000e+00> : vector<8xf32>
    %28 = vector.multi_reduction <add>, %27, %cst_11 [1] : vector<8x8xf32> to vector<8xf32>
    %29 = vector.shape_cast %28 : vector<8xf32> to vector<8x1xf32>
    %30 = vector.broadcast %29 : vector<8x1xf32> to vector<8x8xf32>
    %31 = arith.divf %27, %30 : vector<8x8xf32>
    %c0_12 = arith.constant 0 : index
    %c0_13 = arith.constant 0 : index
    %c0_14 = arith.constant 0 : index
    %c0_15 = arith.constant 0 : index
    %32 = vector.load %arg10[%c0_12, %c0_13, %c0_14, %c0_15] : memref<1x4x8x8xf32, #tpu.memory_space<vmem>>, vector<1x1x8x8xf32>
    %33 = vector.shape_cast %32 : vector<1x1x8x8xf32> to vector<8x8xf32>
    %34 = vector.shape_cast %31 : vector<8x8xf32> to vector<1x1x8x8xf32>
    tpu.vector_store %arg10[%c0_12, %c0_13, %c0_14, %c0_15], %34 {strides = array<i32>} : memref<1x4x8x8xf32, #tpu.memory_space<vmem>>, vector<1x1x8x8xf32>,
    %cst_16 = arith.constant dense<0.000000e+00> : vector<8x8xf32>
    %35 = tpu.matmul %31, %19, %cst_16 {dimension_numbers = #tpu.dot_dimension_numbers<[1], [0], [0], [1], [0, 0, 1, 1], [], []>} : vector<8x8xf32>, vector<8x8xf32>, vector<8x8xf32> -> vector<8x8xf32>
    %36 = vector.extract_strided_slice %10 {offsets = [0, 8], sizes = [8, 8], strides = [1, 1]} : vector<8x32xf32> to vector<8x8xf32>
    %37 = vector.extract_strided_slice %13 {offsets = [0, 8], sizes = [8, 8], strides = [1, 1]} : vector<8x32xf32> to vector<8x8xf32>
    %38 = vector.extract_strided_slice %16 {offsets = [0, 8], sizes = [8, 8], strides = [1, 1]} : vector<8x32xf32> to vector<8x8xf32>
    %cst_17 = arith.constant dense<0.000000e+00> : vector<8x8xf32>
    %39 = tpu.matmul %36, %37, %cst_17 {dimension_numbers = #tpu.dot_dimension_numbers<[1], [1], [0], [0], [0, 0, 1, 0], [], []>} : vector<8x8xf32>, vector<8x8xf32>, vector<8x8xf32> -> vector<8x8xf32>
    %cst_18 = arith.constant 0.353553385 : f32
    %40 = vector.broadcast %cst_18 : f32 to vector<8x8xf32>
    %41 = arith.mulf %39, %40 : vector<8x8xf32>
    %cst_19 = arith.constant dense<0xFF800000> : vector<8xf32>
    %42 = vector.multi_reduction <maximumf>, %41, %cst_19 [1] : vector<8x8xf32> to vector<8xf32>
    %43 = vector.shape_cast %42 : vector<8xf32> to vector<8x1xf32>
    %44 = vector.broadcast %43 : vector<8x1xf32> to vector<8x8xf32>
    %45 = arith.subf %41, %44 : vector<8x8xf32>
    %46 = math.exp %45 : vector<8x8xf32>
    %cst_20 = arith.constant dense<0.000000e+00> : vector<8xf32>
    %47 = vector.multi_reduction <add>, %46, %cst_20 [1] : vector<8x8xf32> to vector<8xf32>
    %48 = vector.shape_cast %47 : vector<8xf32> to vector<8x1xf32>
    %49 = vector.broadcast %48 : vector<8x1xf32> to vector<8x8xf32>
    %50 = arith.divf %46, %49 : vector<8x8xf32>
    %c0_21 = arith.constant 0 : index
    %c1 = arith.constant 1 : index
    %c0_22 = arith.constant 0 : index
    %c0_23 = arith.constant 0 : index
    %51 = vector.load %arg10[%c0_21, %c1, %c0_22, %c0_23] : memref<1x4x8x8xf32, #tpu.memory_space<vmem>>, vector<1x1x8x8xf32>
    %52 = vector.shape_cast %51 : vector<1x1x8x8xf32> to vector<8x8xf32>
    %53 = vector.shape_cast %50 : vector<8x8xf32> to vector<1x1x8x8xf32>
    tpu.vector_store %arg10[%c0_21, %c1, %c0_22, %c0_23], %53 {strides = array<i32>} : memref<1x4x8x8xf32, #tpu.memory_space<vmem>>, vector<1x1x8x8xf32>,
    %cst_24 = arith.constant dense<0.000000e+00> : vector<8x8xf32>
    %54 = tpu.matmul %50, %38, %cst_24 {dimension_numbers = #tpu.dot_dimension_numbers<[1], [0], [0], [1], [0, 0, 1, 1], [], []>} : vector<8x8xf32>, vector<8x8xf32>, vector<8x8xf32> -> vector<8x8xf32>
    %55 = vector.extract_strided_slice %10 {offsets = [0, 16], sizes = [8, 8], strides = [1, 1]} : vector<8x32xf32> to vector<8x8xf32>
    %56 = vector.extract_strided_slice %13 {offsets = [0, 16], sizes = [8, 8], strides = [1, 1]} : vector<8x32xf32> to vector<8x8xf32>
    %57 = vector.extract_strided_slice %16 {offsets = [0, 16], sizes = [8, 8], strides = [1, 1]} : vector<8x32xf32> to vector<8x8xf32>
    %cst_25 = arith.constant dense<0.000000e+00> : vector<8x8xf32>
    %58 = tpu.matmul %55, %56, %cst_25 {dimension_numbers = #tpu.dot_dimension_numbers<[1], [1], [0], [0], [0, 0, 1, 0], [], []>} : vector<8x8xf32>, vector<8x8xf32>, vector<8x8xf32> -> vector<8x8xf32>
    %cst_26 = arith.constant 0.353553385 : f32
    %59 = vector.broadcast %cst_26 : f32 to vector<8x8xf32>
    %60 = arith.mulf %58, %59 : vector<8x8xf32>
    %cst_27 = arith.constant dense<0xFF800000> : vector<8xf32>
    %61 = vector.multi_reduction <maximumf>, %60, %cst_27 [1] : vector<8x8xf32> to vector<8xf32>
    %62 = vector.shape_cast %61 : vector<8xf32> to vector<8x1xf32>
    %63 = vector.broadcast %62 : vector<8x1xf32> to vector<8x8xf32>
    %64 = arith.subf %60, %63 : vector<8x8xf32>
    %65 = math.exp %64 : vector<8x8xf32>
    %cst_28 = arith.constant dense<0.000000e+00> : vector<8xf32>
    %66 = vector.multi_reduction <add>, %65, %cst_28 [1] : vector<8x8xf32> to vector<8xf32>
    %67 = vector.shape_cast %66 : vector<8xf32> to vector<8x1xf32>
    %68 = vector.broadcast %67 : vector<8x1xf32> to vector<8x8xf32>
    %69 = arith.divf %65, %68 : vector<8x8xf32>
    %c0_29 = arith.constant 0 : index
    %c2 = arith.constant 2 : index
    %c0_30 = arith.constant 0 : index
    %c0_31 = arith.constant 0 : index
    %70 = vector.load %arg10[%c0_29, %c2, %c0_30, %c0_31] : memref<1x4x8x8xf32, #tpu.memory_space<vmem>>, vector<1x1x8x8xf32>
    %71 = vector.shape_cast %70 : vector<1x1x8x8xf32> to vector<8x8xf32>
    %72 = vector.shape_cast %69 : vector<8x8xf32> to vector<1x1x8x8xf32>
    tpu.vector_store %arg10[%c0_29, %c2, %c0_30, %c0_31], %72 {strides = array<i32>} : memref<1x4x8x8xf32, #tpu.memory_space<vmem>>, vector<1x1x8x8xf32>,
    %cst_32 = arith.constant dense<0.000000e+00> : vector<8x8xf32>
    %73 = tpu.matmul %69, %57, %cst_32 {dimension_numbers = #tpu.dot_dimension_numbers<[1], [0], [0], [1], [0, 0, 1, 1], [], []>} : vector<8x8xf32>, vector<8x8xf32>, vector<8x8xf32> -> vector<8x8xf32>
    %74 = vector.extract_strided_slice %10 {offsets = [0, 24], sizes = [8, 8], strides = [1, 1]} : vector<8x32xf32> to vector<8x8xf32>
    %75 = vector.extract_strided_slice %13 {offsets = [0, 24], sizes = [8, 8], strides = [1, 1]} : vector<8x32xf32> to vector<8x8xf32>
    %76 = vector.extract_strided_slice %16 {offsets = [0, 24], sizes = [8, 8], strides = [1, 1]} : vector<8x32xf32> to vector<8x8xf32>
    %cst_33 = arith.constant dense<0.000000e+00> : vector<8x8xf32>
    %77 = tpu.matmul %74, %75, %cst_33 {dimension_numbers = #tpu.dot_dimension_numbers<[1], [1], [0], [0], [0, 0, 1, 0], [], []>} : vector<8x8xf32>, vector<8x8xf32>, vector<8x8xf32> -> vector<8x8xf32>
    %cst_34 = arith.constant 0.353553385 : f32
    %78 = vector.broadcast %cst_34 : f32 to vector<8x8xf32>
    %79 = arith.mulf %77, %78 : vector<8x8xf32>
    %cst_35 = arith.constant dense<0xFF800000> : vector<8xf32>
    %80 = vector.multi_reduction <maximumf>, %79, %cst_35 [1] : vector<8x8xf32> to vector<8xf32>
    %81 = vector.shape_cast %80 : vector<8xf32> to vector<8x1xf32>
    %82 = vector.broadcast %81 : vector<8x1xf32> to vector<8x8xf32>
    %83 = arith.subf %79, %82 : vector<8x8xf32>
    %84 = math.exp %83 : vector<8x8xf32>
    %cst_36 = arith.constant dense<0.000000e+00> : vector<8xf32>
    %85 = vector.multi_reduction <add>, %84, %cst_36 [1] : vector<8x8xf32> to vector<8xf32>
    %86 = vector.shape_cast %85 : vector<8xf32> to vector<8x1xf32>
    %87 = vector.broadcast %86 : vector<8x1xf32> to vector<8x8xf32>
    %88 = arith.divf %84, %87 : vector<8x8xf32>
    %c0_37 = arith.constant 0 : index
    %c3 = arith.constant 3 : index
    %c0_38 = arith.constant 0 : index
    %c0_39 = arith.constant 0 : index
    %89 = vector.load %arg10[%c0_37, %c3, %c0_38, %c0_39] : memref<1x4x8x8xf32, #tpu.memory_space<vmem>>, vector<1x1x8x8xf32>
    %90 = vector.shape_cast %89 : vector<1x1x8x8xf32> to vector<8x8xf32>
    %91 = vector.shape_cast %88 : vector<8x8xf32> to vector<1x1x8x8xf32>
    tpu.vector_store %arg10[%c0_37, %c3, %c0_38, %c0_39], %91 {strides = array<i32>} : memref<1x4x8x8xf32, #tpu.memory_space<vmem>>, vector<1x1x8x8xf32>,
    %cst_40 = arith.constant dense<0.000000e+00> : vector<8x8xf32>
    %92 = tpu.matmul %88, %76, %cst_40 {dimension_numbers = #tpu.dot_dimension_numbers<[1], [0], [0], [1], [0, 0, 1, 1], [], []>} : vector<8x8xf32>, vector<8x8xf32>, vector<8x8xf32> -> vector<8x8xf32>
    %93 = tpu.concatenate %35, %54, %73, %92 in 1 : vector<8x8xf32>, vector<8x8xf32>, vector<8x8xf32>, vector<8x8xf32> -> vector<8x32xf32>
    %c0_41 = arith.constant 0 : index
    %c0_42 = arith.constant 0 : index
    %c0_43 = arith.constant 0 : index
    %94 = vector.load %arg4[%c0_41, %c0_42, %c0_43] : memref<1x8x32xf32, #tpu.memory_space<vmem>>, vector<1x8x32xf32>
    %95 = vector.shape_cast %94 : vector<1x8x32xf32> to vector<8x32xf32>
    %96 = arith.addf %93, %95 : vector<8x32xf32>
    %c0_44 = arith.constant 0 : index
    %c0_45 = arith.constant 0 : index
    %c0_46 = arith.constant 0 : index
    %97 = vector.load %arg9[%c0_44, %c0_45, %c0_46] : memref<1x8x32xf32, #tpu.memory_space<vmem>>, vector<1x8x32xf32>
    %98 = vector.shape_cast %97 : vector<1x8x32xf32> to vector<8x32xf32>
    %99 = vector.shape_cast %96 : vector<8x32xf32> to vector<1x8x32xf32>
    tpu.vector_store %arg9[%c0_44, %c0_45, %c0_46], %99 {strides = array<i32>} : memref<1x8x32xf32, #tpu.memory_space<vmem>>, vector<1x8x32xf32>,
    return
  }
  func.func @transform_0(%arg0: i32, %arg1: i32, %arg2: i32) -> (i32, i32, i32) {
    %c0_i32 = arith.constant 0 : i32
    %c0_i32_0 = arith.constant 0 : i32
    %c0_i32_1 = arith.constant 0 : i32
    return %arg0, %c0_i32, %c0_i32_0 : i32, i32, i32
  }
  func.func @transform_1(%arg0: i32, %arg1: i32, %arg2: i32) -> (i32, i32, i32) {
    %c0_i32 = arith.constant 0 : i32
    return %arg0, %arg1, %arg2 : i32, i32, i32
  }
  func.func @transform_2(%arg0: i32, %arg1: i32, %arg2: i32) -> (i32, i32) {
    %c0_i32 = arith.constant 0 : i32
    %c0_i32_0 = arith.constant 0 : i32
    %c0_i32_1 = arith.constant 0 : i32
    return %c0_i32, %c0_i32_0 : i32, i32
  }
  func.func @transform_3(%arg0: i32, %arg1: i32, %arg2: i32) -> (i32, i32) {
    %c0_i32 = arith.constant 0 : i32
    %c0_i32_0 = arith.constant 0 : i32
    %c0_i32_1 = arith.constant 0 : i32
    return %c0_i32, %c0_i32_0 : i32, i32
  }
  func.func @transform_4(%arg0: i32, %arg1: i32, %arg2: i32) -> (i32, i32) {
    %c0_i32 = arith.constant 0 : i32
    %c0_i32_0 = arith.constant 0 : i32
    %c0_i32_1 = arith.constant 0 : i32
    return %c0_i32, %c0_i32_0 : i32, i32
  }
  func.func @transform_5(%arg0: i32, %arg1: i32, %arg2: i32) -> (i32, i32) {
    %c0_i32 = arith.constant 0 : i32
    %c0_i32_0 = arith.constant 0 : i32
    %c0_i32_1 = arith.constant 0 : i32
    return %c0_i32, %c0_i32_0 : i32, i32
  }
  func.func @transform_6(%arg0: i32, %arg1: i32, %arg2: i32) -> (i32, i32, i32) {
    %c0_i32 = arith.constant 0 : i32
    return %arg0, %arg1, %arg2 : i32, i32, i32
  }
  func.func @transform_7(%arg0: i32, %arg1: i32, %arg2: i32) -> (i32, i32, i32, i32) {
    %c0_i32 = arith.constant 0 : i32
    %c0_i32_0 = arith.constant 0 : i32
    return %arg0, %arg2, %arg1, %c0_i32 : i32, i32, i32, i32
  }
}

</mosaic_0001>

<bundles_post_ra>
// kernel: transformer_forward.5
= control target key start
LH: loop header
LB: loop body
LE: loop exit
PB: predicated region body
PF: predicated region fallthrough
CT: control target
= control target key end

     0   :  { %vm34_vm0 = vcmask 261120   ;;  %v433_v62 = vmov 0.0   ;;  %s582_s0 = inlined_call_operand.vmem [shape: f32[16,32], index: 0, kind: input, shape index: {}]   ;;  %s583_s3 = inlined_call_operand.vmem [shape: f32[32,128], index: 3, kind: input, shape index: {}]   ;;  %s584_s5 = inlined_call_operand.vmem [shape: f32[128,32], index: 5, kind: input, shape index: {}]   ;;  %s585_s1 = inlined_call_operand.vmem [shape: f32[1,32], index: 1, kind: input, shape index: {}]   ;;  %s586_s2 = inlined_call_operand.vmem [shape: f32[1,32], index: 2, kind: input, shape index: {}]   ;;  %s587_s4 = inlined_call_operand.vmem [shape: f32[1,128], index: 4, kind: input, shape index: {}]   ;;  %s588_s6 = inlined_call_operand.vmem [shape: f32[1,32], index: 6, kind: input, shape index: {}]   ;;  %s589_s7 = inlined_call_operand.vmem [shape: f32[16,32], index: 7, kind: output, shape index: {}]  }
   0x1   :  { %v477_v0 = vld [vmem:[%s582_s0] sm:$0xff]  ;;  %v482_v1 = vld [vmem:[%s582_s0 + $0x8] sm:$0xff]  ;;  %v86_v17 = vld [vmem:[%s583_s3 + $0x10] sm:$0xff]  ;;  %81 = vst.msk [vmem:[#allocation3 + $0x8] sm:$0xff] %vm34_vm0, %v433_v62 }
   0x2   :  { %v35_v2 = vsel %vm34_vm0, %v477_v0, 0.0  ;;  %v38_v3 = vsel %vm34_vm0, %v482_v1, 0.0  ;;  %v84_v14 = vld [vmem:[%s583_s3] sm:$0xff]  ;;  %v85_v15 = vld [vmem:[%s583_s3 + $0x8] sm:$0xff]  ;;  %v87_v18 = vld [vmem:[%s583_s3 + $0x18] sm:$0xff]  ;;  %80 = vst.msk [vmem:[#allocation3] sm:$0xff] %vm34_vm0, %v433_v62 }
   0x3   :  { %36 = vadd.xlane.f32.xlu0 %v35_v2  ;;  %v384_v16 = vpack.c.bf16 %v85_v15, %v84_v14  ;;  %v388_v19 = vpack.c.bf16 %v87_v18, %v86_v17  ;;  %v189_v20 = vld [vmem:[%s584_s5] sm:$0xff]  ;;  %v190_v21 = vld [vmem:[%s584_s5 + $0x8] sm:$0xff]  ;;  %v191_v22 = vld [vmem:[%s584_s5 + $0x10] sm:$0xff] }
   0x4   :  { %v392_v23 = vpack.c.bf16 %v190_v21, %v189_v20  ;;  %v192_v24 = vld [vmem:[%s584_s5 + $0x18] sm:$0xff]  ;;  %v193_v26 = vld [vmem:[%s584_s5 + $0x20] sm:$0xff]  ;;  %v194_v27 = vld [vmem:[%s584_s5 + $0x28] sm:$0xff] }
   0x5   :  { %385 = vmatprep.subr.bf16.mxu0 %v384_v16  ;;  %v396_v25 = vpack.c.bf16 %v192_v24, %v191_v22  ;;  %v400_v28 = vpack.c.bf16 %v194_v27, %v193_v26  ;;  %v308_v36 = vld [vmem:[%s585_s1] ss:$0 sm:$0xff]  ;;  %v195_v47 = vld [vmem:[%s584_s5 + $0x30] sm:$0xff]  ;;  %v196_v48 = vld [vmem:[%s584_s5 + $0x38] sm:$0xff] }
   0x6   :  { %387 = vmatpush3.bf16.msra.mxu0 %v384_v16  ;;  %393 = vmatprep.subr.bf16.mxu1 %v392_v23  ;;  %v309_v38 = vld [vmem:[%s586_s2] ss:$0 sm:$0xff]  ;;  %v404_v49 = vpack.c.bf16 %v196_v48, %v195_v47  ;;  %v198_v51 = vld [vmem:[%s584_s5 + $0x48] sm:$0xff]  ;;  %v199_v53 = vld [vmem:[%s584_s5 + $0x50] sm:$0xff] }
   0x7   :  { %39 = vadd.xlane.f32.xlu0 %v38_v3  ;;  %389 = vmatprep.subr.bf16.mxu0 %v388_v19  ;;  %v197_v50 = vld [vmem:[%s584_s5 + $0x40] sm:$0xff]  ;;  %v200_v54 = vld [vmem:[%s584_s5 + $0x58] sm:$0xff]  ;;  %v202_v57 = vld [vmem:[%s584_s5 + $0x68] sm:$0xff] }
   0x8   :  { %395 = vmatpush3.bf16.msra.mxu1 %v392_v23  ;;  %v408_v52 = vpack.c.bf16 %v198_v51, %v197_v50  ;;  %v412_v55 = vpack.c.bf16 %v200_v54, %v199_v53  ;;  %v201_v56 = vld [vmem:[%s584_s5 + $0x60] sm:$0xff]  ;;  %v203_v59 = vld [vmem:[%s584_s5 + $0x70] sm:$0xff]  ;;  %v204_v60 = vld [vmem:[%s584_s5 + $0x78] sm:$0xff] }
   0x9   :  { %397 = vmatprep.subr.bf16.mxu1 %v396_v25  ;;  %v416_v58 = vpack.c.bf16 %v202_v57, %v201_v56  ;;  %v420_v61 = vpack.c.bf16 %v204_v60, %v203_v59  ;;  %v310_v63 = vld [vmem:[%s587_s4] ss:$0 sm:$0xff]  ;;  %v188_v16 = vld [vmem:[#allocation3 + $0x8] sm:$0xff]  ;;  %v187_v17 = vld [vmem:[#allocation3] sm:$0xff] }
   0xa   :  { %391 = vmatpush3.bf16.msra.mxu0 %v388_v19  ;;  %v313_v22 = vld [vmem:[%s588_s6] ss:$0 sm:$0xff] }
   0xc   :  { %399 = vmatpush3.bf16.msra.mxu1 %v396_v25 }
   0xd   :  { %401 = vmatprep.subr.bf16.mxu1 %v400_v28 }
  0x10   :  { %403 = vmatpush3.bf16.msra.mxu1 %v400_v28 }
  0x11   :  { %405 = vmatprep.subr.bf16.mxu1 %v404_v49 }
  0x14   :  { %407 = vmatpush3.bf16.msra.mxu1 %v404_v49 }
  0x15   :  { %409 = vmatprep.subr.bf16.mxu1 %v408_v52 }
  0x18   :  { %411 = vmatpush3.bf16.msra.mxu1 %v408_v52 }
  0x19   :  { %413 = vmatprep.subr.bf16.mxu1 %v412_v55 }
  0x1c   :  { %415 = vmatpush3.bf16.msra.mxu1 %v412_v55 }
  0x1d   :  { %417 = vmatprep.subr.bf16.mxu1 %v416_v58 }
  0x20   :  { %419 = vmatpush3.bf16.msra.mxu1 %v416_v58 }
  0x21   :  { %421 = vmatprep.subr.bf16.mxu1 %v420_v61 }
  0x24   :  { %423 = vmatpush3.bf16.msra.mxu1 %v420_v61 }
  0x90   :  { %v37_v4 = vpop.xlane.xlu0 %36 }
  0x91   :  { %v42_v5 = vmul.f32 0.03125, %v37_v4 }
  0x93   :  { %v44_v6 = vsub.f32 %v477_v0, %v42_v5 }
  0x94   :  { %v40_v7 = vpop.xlane.xlu0 %39 }
  0x95   :  { %v43_v8 = vmul.f32 0.03125, %v40_v7  ;;  %v46_v9 = vmul.f32 %v44_v6, %v44_v6 }
  0x97   :  { %v45_v10 = vsub.f32 %v482_v1, %v43_v8  ;;  %v48_v11 = vsel %vm34_vm0, %v46_v9, 0.0 }
  0x98   :  { %49 = vadd.xlane.f32.xlu1 %v48_v11 }
  0x99   :  { %v47_v12 = vmul.f32 %v45_v10, %v45_v10 }
  0x9b   :  { %v51_v13 = vsel %vm34_vm0, %v47_v12, 0.0 }
  0x9c   :  { %52 = vadd.xlane.f32.xlu1 %v51_v13 }
 0x125   :  { %v50_v29 = vpop.xlane.xlu1 %49 }
 0x126   :  { %v54_v30 = vmul.f32 0.03125, %v50_v29 }
 0x128   :  { %v56_v31 = vadd.f32 1e-05, %v54_v30 }
 0x129   :  { %v53_v32 = vpop.xlane.xlu1 %52 }
 0x12a   :  { %425 = vrsqrt.f32 %v56_v31  ;;  %v55_v33 = vmul.f32 0.03125, %v53_v32 }
 0x12c   :  { %v57_v34 = vadd.f32 1e-05, %v55_v33 }
 0x12e   :  { %427 = vrsqrt.f32 %v57_v34 }
 0x134   :  { %v426_v35 = vpop.eup %425 }
 0x135   :  { %v60_v37 = vmul.f32 %v426_v35, %v44_v6 }
 0x137   :  { %v68_v39 = vmul.f32 %v308_v36, %v60_v37 }
 0x138   :  { %v428_v40 = vpop.eup %427 }
 0x139   :  { %v76_v41 = vadd.f32 %v309_v38, %v68_v39  ;;  %v61_v42 = vmul.f32 %v428_v40, %v45_v10 }
 0x13b   :  { %78 = vst.msk [vmem:[#allocation2] sm:$0xff] %vm34_vm0, %v76_v41  ;;  %v69_v43 = vmul.f32 %v308_v36, %v61_v42 }
 0x13d   :  { %v77_v44 = vadd.f32 %v309_v38, %v69_v43 }
 0x13f   :  { %79 = vst.msk [vmem:[#allocation2 + $0x8] sm:$0xff] %vm34_vm0, %v77_v44 }
 0x142   :  { %v82_v45 = vld [vmem:[#allocation2] sm:$0xff] }
 0x143   :  { %346 = vmatprep.mubr.msk.f32.mxu0 %vm34_vm0, %v82_v45 }
 0x146   :  { %v83_v46 = vld [vmem:[#allocation2 + $0x8] sm:$0xff] }
 0x147   :  { %347 = vmatmul.mubr.msk.f32.vlgmr.msra.gmra.mrb[0].mxu0 %vm34_vm0, %v83_v46 }
 0x21a   :  { %v348_v2 = vpop.f32.mrb[0].mxu0 }
 0x21b   :  { %v174_v3 = vadd.f32 %v348_v2, %v310_v63  ;;  %v168_v4 = vpop.f32.mrb[1].mxu0 }
 0x21c   :  { %v169_v5 = vadd.f32 %v310_v63, %v168_v4 }
 0x21d   :  { %v180_v6 = vmul.f32 0.70710677, %v174_v3  ;;  %v178_v13 = vmul.f32 0.5, %v174_v3 }
 0x21e   :  { %v179_v7 = vmul.f32 0.70710677, %v169_v5  ;;  %v177_v11 = vmul.f32 0.5, %v169_v5 }
 0x21f   :  { %429 = verf.f32 %v180_v6 }
 0x220   :  { %431 = verf.f32 %v179_v7 }
 0x229   :  { %v430_v8 = vpop.eup %429 }
 0x22a   :  { %v432_v9 = vpop.eup %431  ;;  %v184_v10 = vadd.f32 1.0, %v430_v8 }
 0x22b   :  { %v183_v12 = vadd.f32 1.0, %v432_v9 }
 0x22c   :  { %v186_v15 = vmul.f32 %v184_v10, %v178_v13 }
 0x22d   :  { %v185_v14 = vmul.f32 %v183_v12, %v177_v11 }
 0x22f   :  { %381 = vmatprep.mubr.f32.mxu1 %v185_v14 }
 0x230   :  { %382 = vmatmul.mubr.f32.vlgmr.msra.gmra.mrb[0].mxu1 %v186_v15 }
 0x303   :  { %v383_v18 = vpop.f32.mrb[0].mxu1 }
 0x304   :  { %v281_v19 = vadd.f32 %v383_v18, %v188_v16  ;;  %v271_v20 = vpop.f32.mrb[1].mxu1 }
 0x305   :  { %v280_v21 = vadd.f32 %v271_v20, %v187_v17 }
 0x306   :  { %283 = vst.msk [vmem:[#allocation3 + $0x8] sm:$0xff] %vm34_vm0, %v281_v19 }
 0x307   :  { %282 = vst.msk [vmem:[#allocation3] sm:$0xff] %vm34_vm0, %v280_v21 }
 0x30d   :  { %v288_v23 = vld [vmem:[#allocation3 + $0x8] sm:$0xff] }
 0x30e   :  { %v297_v24 = vadd.f32 %v313_v22, %v288_v23  ;;  %v287_v25 = vld [vmem:[#allocation3] sm:$0xff] }
 0x30f   :  { %v296_v26 = vadd.f32 %v313_v22, %v287_v25 }
 0x310   :  { %v301_v27 = vadd.f32 %v482_v1, %v297_v24 }
 0x311   :  { %v300_v28 = vadd.f32 %v296_v26, %v477_v0 }
 0x312   :  { %303 = vst.msk [vmem:[%s589_s7 + $0x8] sm:$0xff] %vm34_vm0, %v301_v27 }
 0x313   :  { %302 = vst.msk [vmem:[%s589_s7] sm:$0xff] %vm34_vm0, %v300_v28 }

// kernel: transformer_forward.7
= control target key start
LH: loop header
LB: loop body
LE: loop exit
PB: predicated region body
PF: predicated region fallthrough
CT: control target
= control target key end

     0   :  { %vm35_vm0 = vcmask 261120   ;;  %s631_s0 = inlined_call_operand.vmem [shape: f32[16,32], index: 0, kind: input, shape index: {}]   ;;  %s632_s1 = inlined_call_operand.vmem [shape: f32[1,32], index: 1, kind: input, shape index: {}]   ;;  %s633_s2 = inlined_call_operand.vmem [shape: f32[1,32], index: 2, kind: input, shape index: {}]   ;;  %s634_s3 = inlined_call_operand.vmem [shape: f32[32,128], index: 3, kind: input, shape index: {}]   ;;  %s635_s4 = inlined_call_operand.vmem [shape: f32[1,128], index: 4, kind: input, shape index: {}]   ;;  %s636_s5 = inlined_call_operand.vmem [shape: f32[128,32], index: 5, kind: input, shape index: {}]   ;;  %s637_s6 = inlined_call_operand.vmem [shape: f32[1,32], index: 6, kind: input, shape index: {}]   ;;  %s638_s7 = inlined_call_operand.hbm [shape: f32[16,32], index: 7, kind: output, shape index: {}]  }
   0x1   :  { %v520_v0 = vld [vmem:[%s631_s0] sm:$0xff]  ;;  %v525_v1 = vld [vmem:[%s631_s0 + $0x8] sm:$0xff] }
   0x2   :  { %12 = vsyncpa [#allocation5], 0  ;;  %v36_v2 = vsel %vm35_vm0, %v520_v0, 0.0  ;;  %v39_v3 = vsel %vm35_vm0, %v525_v1, 0.0  ;;  %v85_v14 = vld [vmem:[%s634_s3] sm:$0xff]  ;;  %v86_v15 = vld [vmem:[%s634_s3 + $0x8] sm:$0xff] }
   0x3   :  { %37 = vadd.xlane.f32.xlu0 %v36_v2  ;;  %v397_v16 = vpack.c.bf16 %v86_v15, %v85_v14  ;;  %v87_v17 = vld [vmem:[%s634_s3 + $0x10] sm:$0xff]  ;;  %v88_v18 = vld [vmem:[%s634_s3 + $0x18] sm:$0xff]  ;;  %v190_v20 = vld [vmem:[%s636_s5] sm:$0xff]  ;;  %v473_v62 = vmov 0.0   ;;  %s474_s22 = smov [#allocation4]  }
   0x4   :  { %v401_v19 = vpack.c.bf16 %v88_v18, %v87_v17  ;;  %v191_v21 = vld [vmem:[%s636_s5 + $0x8] sm:$0xff]  ;;  %v192_v22 = vld [vmem:[%s636_s5 + $0x10] sm:$0xff]  ;;  %v193_v24 = vld [vmem:[%s636_s5 + $0x18] sm:$0xff]  ;;  %82 = vst.msk [vmem:[#allocation3 + $0x8] sm:$0xff] %vm35_vm0, %v473_v62  ;;  %s310_s23 = sshll.u32 %s474_s22, 4  ;;  %s311_s23 = int_to_ptr.vmem [resolvable:$true] %s310_s23 }
   0x5   :  { %398 = vmatprep.subr.bf16.mxu0 %v397_v16  ;;  %v405_v23 = vpack.c.bf16 %v191_v21, %v190_v20  ;;  %v409_v25 = vpack.c.bf16 %v193_v24, %v192_v22  ;;  %v194_v26 = vld [vmem:[%s636_s5 + $0x20] sm:$0xff]  ;;  %v195_v27 = vld [vmem:[%s636_s5 + $0x28] sm:$0xff]  ;;  %v196_v47 = vld [vmem:[%s636_s5 + $0x30] sm:$0xff]  ;;  %81 = vst.msk [vmem:[#allocation3] sm:$0xff] %vm35_vm0, %v473_v62  ;;  %s449_s24 = scalar_lea.vmem %s311_s23, 256  ;;  %p454_p1 = scmp.lt.s32.totalorder %s311_s23, %s311_s23 }
   0x6   :  { %400 = vmatpush3.bf16.msra.mxu0 %v397_v16  ;;  %v413_v28 = vpack.c.bf16 %v195_v27, %v194_v26  ;;  %v321_v36 = vld [vmem:[%s632_s1] ss:$0 sm:$0xff]  ;;  %v197_v48 = vld [vmem:[%s636_s5 + $0x38] sm:$0xff]  ;;  %v199_v51 = vld [vmem:[%s636_s5 + $0x48] sm:$0xff]  ;;  %p450_p0 = scmp.ne.s32.totalorder %s311_s23, %s449_s24  ;;  %p455_p2 = scmp.lt.s32.totalorder %s449_s24, %s449_s24 }
   0x7   :  { %40 = vadd.xlane.f32.xlu0 %v39_v3  ;;  %402 = vmatprep.subr.bf16.mxu0 %v401_v19  ;;  %v322_v38 = vld [vmem:[%s633_s2] ss:$0 sm:$0xff]  ;;  %v417_v49 = vpack.c.bf16 %v197_v48, %v196_v47  ;;  %v200_v53 = vld [vmem:[%s636_s5 + $0x50] sm:$0xff]  ;;  %v201_v54 = vld [vmem:[%s636_s5 + $0x58] sm:$0xff] }
   0x8   :  { %406 = vmatprep.subr.bf16.mxu1 %v405_v23  ;;  %v198_v50 = vld [vmem:[%s636_s5 + $0x40] sm:$0xff]  ;;  %v425_v55 = vpack.c.bf16 %v201_v54, %v200_v53  ;;  %v203_v57 = vld [vmem:[%s636_s5 + $0x68] sm:$0xff]  ;;  %v204_v59 = vld [vmem:[%s636_s5 + $0x70] sm:$0xff]  ;;  %p456_p3 = por %p455_p2, %p454_p1 }
   0x9   :  { %408 = vmatpush3.bf16.msra.mxu1 %v405_v23  ;;  %v421_v52 = vpack.c.bf16 %v199_v51, %v198_v50  ;;  %v202_v56 = vld [vmem:[%s636_s5 + $0x60] sm:$0xff]  ;;  %v205_v60 = vld [vmem:[%s636_s5 + $0x78] sm:$0xff] }
   0xa   :  { %404 = vmatpush3.bf16.msra.mxu0 %v401_v19  ;;  %410 = vmatprep.subr.bf16.mxu1 %v409_v25  ;;  %v429_v58 = vpack.c.bf16 %v203_v57, %v202_v56  ;;  %v433_v61 = vpack.c.bf16 %v205_v60, %v204_v59  ;;  %v323_v63 = vld [vmem:[%s635_s4] ss:$0 sm:$0xff]  ;;  %p457_p4 = pnand %p456_p3, %p450_p0 }
   0xb   :  { %v189_v16 = vld [vmem:[#allocation3 + $0x8] sm:$0xff]  ;;  %v326_v22 = vld [vmem:[%s637_s6] ss:$0 sm:$0xff] }
   0xc   :  { %v188_v17 = vld [vmem:[#allocation3] sm:$0xff] }
   0xd   :  { %412 = vmatpush3.bf16.msra.mxu1 %v409_v25 }
   0xe   :  { %414 = vmatprep.subr.bf16.mxu1 %v413_v28 }
  0x11   :  { %416 = vmatpush3.bf16.msra.mxu1 %v413_v28 }
  0x12   :  { %418 = vmatprep.subr.bf16.mxu1 %v417_v49 }
  0x15   :  { %420 = vmatpush3.bf16.msra.mxu1 %v417_v49 }
  0x16   :  { %422 = vmatprep.subr.bf16.mxu1 %v421_v52 }
  0x19   :  { %424 = vmatpush3.bf16.msra.mxu1 %v421_v52 }
  0x1a   :  { %426 = vmatprep.subr.bf16.mxu1 %v425_v55 }
  0x1d   :  { %428 = vmatpush3.bf16.msra.mxu1 %v425_v55 }
  0x1e   :  { %430 = vmatprep.subr.bf16.mxu1 %v429_v58 }
  0x21   :  { %432 = vmatpush3.bf16.msra.mxu1 %v429_v58 }
  0x22   :  { %434 = vmatprep.subr.bf16.mxu1 %v433_v61 }
  0x25   :  { %436 = vmatpush3.bf16.msra.mxu1 %v433_v61 }
  0x90   :  { %v38_v4 = vpop.xlane.xlu0 %37 }
  0x91   :  { %v43_v5 = vmul.f32 0.03125, %v38_v4 }
  0x93   :  { %v45_v6 = vsub.f32 %v520_v0, %v43_v5 }
  0x94   :  { %v41_v7 = vpop.xlane.xlu0 %40 }
  0x95   :  { %v44_v8 = vmul.f32 0.03125, %v41_v7  ;;  %v47_v9 = vmul.f32 %v45_v6, %v45_v6 }
  0x97   :  { %v46_v10 = vsub.f32 %v525_v1, %v44_v8  ;;  %v49_v11 = vsel %vm35_vm0, %v47_v9, 0.0 }
  0x98   :  { %50 = vadd.xlane.f32.xlu1 %v49_v11 }
  0x99   :  { %v48_v12 = vmul.f32 %v46_v10, %v46_v10 }
  0x9b   :  { %v52_v13 = vsel %vm35_vm0, %v48_v12, 0.0 }
  0x9c   :  { %53 = vadd.xlane.f32.xlu1 %v52_v13 }
 0x125   :  { %v51_v29 = vpop.xlane.xlu1 %50 }
 0x126   :  { %v55_v30 = vmul.f32 0.03125, %v51_v29 }
 0x128   :  { %v57_v31 = vadd.f32 1e-05, %v55_v30 }
 0x129   :  { %v54_v32 = vpop.xlane.xlu1 %53 }
 0x12a   :  { %441 = vrsqrt.f32 %v57_v31  ;;  %v56_v33 = vmul.f32 0.03125, %v54_v32 }
 0x12c   :  { %v58_v34 = vadd.f32 1e-05, %v56_v33 }
 0x12e   :  { %443 = vrsqrt.f32 %v58_v34 }
 0x134   :  { %v442_v35 = vpop.eup %441 }
 0x135   :  { %v61_v37 = vmul.f32 %v442_v35, %v45_v6 }
 0x137   :  { %v69_v39 = vmul.f32 %v321_v36, %v61_v37 }
 0x138   :  { %v444_v40 = vpop.eup %443 }
 0x139   :  { %v77_v41 = vadd.f32 %v322_v38, %v69_v39  ;;  %v62_v42 = vmul.f32 %v444_v40, %v46_v10 }
 0x13b   :  { %79 = vst.msk [vmem:[#allocation2] sm:$0xff] %vm35_vm0, %v77_v41  ;;  %v70_v43 = vmul.f32 %v321_v36, %v62_v42 }
 0x13d   :  { %v78_v44 = vadd.f32 %v322_v38, %v70_v43 }
 0x13f   :  { %80 = vst.msk [vmem:[#allocation2 + $0x8] sm:$0xff] %vm35_vm0, %v78_v44 }
 0x142   :  { %v83_v45 = vld [vmem:[#allocation2] sm:$0xff] }
 0x143   :  { %359 = vmatprep.mubr.msk.f32.mxu0 %vm35_vm0, %v83_v45 }
 0x146   :  { %v84_v46 = vld [vmem:[#allocation2 + $0x8] sm:$0xff] }
 0x147   :  { %360 = vmatmul.mubr.msk.f32.vlgmr.msra.gmra.mrb[0].mxu0 %vm35_vm0, %v84_v46 }
 0x21a   :  { %v361_v2 = vpop.f32.mrb[0].mxu0 }
 0x21b   :  { %v175_v3 = vadd.f32 %v361_v2, %v323_v63  ;;  %v169_v4 = vpop.f32.mrb[1].mxu0 }
 0x21c   :  { %v170_v5 = vadd.f32 %v323_v63, %v169_v4 }
 0x21d   :  { %v181_v6 = vmul.f32 0.70710677, %v175_v3  ;;  %v179_v13 = vmul.f32 0.5, %v175_v3 }
 0x21e   :  { %v180_v7 = vmul.f32 0.70710677, %v170_v5  ;;  %v178_v11 = vmul.f32 0.5, %v170_v5 }
 0x21f   :  { %445 = verf.f32 %v181_v6 }
 0x220   :  { %447 = verf.f32 %v180_v7 }
 0x229   :  { %v446_v8 = vpop.eup %445 }
 0x22a   :  { %v448_v9 = vpop.eup %447  ;;  %v185_v10 = vadd.f32 1.0, %v446_v8 }
 0x22b   :  { %v184_v12 = vadd.f32 1.0, %v448_v9 }
 0x22c   :  { %v187_v15 = vmul.f32 %v185_v10, %v179_v13 }
 0x22d   :  { %v186_v14 = vmul.f32 %v184_v12, %v178_v11 }
 0x22f   :  { %394 = vmatprep.mubr.f32.mxu1 %v186_v14 }
 0x230   :  { %395 = vmatmul.mubr.f32.vlgmr.msra.gmra.mrb[0].mxu1 %v187_v15 }
 0x303   :  { %v396_v18 = vpop.f32.mrb[0].mxu1 }
 0x304   :  { %v282_v19 = vadd.f32 %v396_v18, %v189_v16  ;;  %v272_v20 = vpop.f32.mrb[1].mxu1 }
 0x305   :  { %v281_v21 = vadd.f32 %v272_v20, %v188_v17 }
 0x306   :  { %284 = vst.msk [vmem:[#allocation3 + $0x8] sm:$0xff] %vm35_vm0, %v282_v19 }
 0x307   :  { %283 = vst.msk [vmem:[#allocation3] sm:$0xff] %vm35_vm0, %v281_v21 }
 0x30d   :  { %v289_v23 = vld [vmem:[#allocation3 + $0x8] sm:$0xff] }
 0x30e   :  { %v288_v24 = vld [vmem:[#allocation3] sm:$0xff]  ;;  %v298_v25 = vadd.f32 %v326_v22, %v289_v23 }
 0x30f   :  { %v297_v26 = vadd.f32 %v326_v22, %v288_v24 }
 0x310   :  { %v302_v27 = vadd.f32 %v298_v25, %v525_v1 }
 0x311   :  { %v301_v28 = vadd.f32 %v297_v26, %v520_v0 }
 0x312   :  { %304 = vst.msk [vmem:[#allocation4 + $0x8] sm:$0xff] %vm35_vm0, %v302_v27 }
 0x313   :  { %303 = vst.msk [vmem:[#allocation4] sm:$0xff] %vm35_vm0, %v301_v28 }
 0x314   :  { %460 = shalt.err (!%p457_p4)
}
 0x315   :  { %s461_s26 = scalar_lea.hbm %s638_s7, 256 }
 0x316   :  { %p462_p5 = scmp.ne.s32.totalorder %s638_s7, %s461_s26  ;;  %p465_p6 = scmp.lt.u32.totalorder %s461_s26, %s638_s7 }
 0x318   :  { %p467_p7 = pnand %p465_p6, %p462_p5 }
 0x31a   :  { %470 = shalt.err (!%p467_p7)
}
 0x31b   :  { %s475_s28 = smov 128   ;;  %s476_s29 = smov 8  }
 0x31c   :  { %316 = dma.vmem_to_hbm [thread:$0]  %s311_s23, 256, %s638_s7, [#allocation5], %s475_s28, %s475_s28, %s476_s29  }
 0x31d   :  { %471 = dma.done.wait [#allocation5], 256  }
 0x31e   :  { %472 = vsyncadd [#allocation5], 4294967040 }
 0x31f   :  { %320 = vsyncpa [#allocation5], 1 }

// kernel: transformer_forward.6
= control target key start
LH: loop header
LB: loop body
LE: loop exit
PB: predicated region body
PF: predicated region fallthrough
CT: control target
= control target key end

     0   :  { %s1867_s24 = smov 0   ;;  %s1869_s25 = smov 0   ;;  %s2034_s0 = inlined_call_operand.vmem [shape: f32[2,8,32], index: 0, kind: input, shape index: {}, may-alias: {0,1}]   ;;  %s2035_s1 = inlined_call_operand.vmem [shape: f32[2,8,32], index: 1, kind: input, shape index: {}, may-alias: {0,1}]   ;;  %s2036_s2 = inlined_call_operand.vmem [shape: f32[1,32], index: 2, kind: input, shape index: {}]   ;;  %s2037_s3 = inlined_call_operand.vmem [shape: f32[1,32], index: 3, kind: input, shape index: {}]   ;;  %s2038_s4 = inlined_call_operand.vmem [shape: f32[32,96], index: 4, kind: input, shape index: {}]   ;;  %s2039_s5 = inlined_call_operand.vmem [shape: f32[1,32], index: 5, kind: input, shape index: {}]   ;;  %s2040_s6 = inlined_call_operand.vmem [shape: f32[2,8,32], index: 6, kind: output, shape index: {0}]   ;;  %s2041_s7 = inlined_call_operand.vmem [shape: f32[2,4,8,8], index: 7, kind: output, shape index: {1}]  }
   0x1   :  { %s1871_s26 = smov 0  }
   0x2 LB: > { %s37_s27 = sadd.s32 1, %s1810_s25  ;;  %p1567_p0 = scmp.ge.s32.totalorder %s1814_s26, 1  ;;  %s1814_s26 = sphi %s1871_s26, %s18_s26   ;;  %s1810_s25 = sphi %s1869_s25, %s2043_s25   ;;  %s1806_s24 = sphi %s1867_s24, %s2042_s24  }
   0x3   : > { %p39_p1 = scmp.ge.s32.totalorder %s37_s27, 2  ;;  %p285_p2 = scmp.lt.s32.totalorder %s1814_s26, 3 }
   0x5   : > { %s2045_s27 = smov (%p39_p1, %s37_s27), 0  ;;  %p286_p3 = pnand %p1567_p0, %p285_p2 }
   0x6   : > { %p343_p4 = scmp.lt.s32.totalorder (!%p286_p3), %s1806_s24, 1  ;;  %vm389_vm0 = vcmask (!%p286_p3), 261120   ;;  %v1898_v2 = vld [vmem:[%s2038_s4] sm:$0xff] (!%p286_p3)  ;;  %v420_v3 = vld [vmem:[%s2038_s4 + $0x8] sm:$0xff] (!%p286_p3)  ;;  %v1906_v4 = vld [vmem:[%s2038_s4 + $0x10] sm:$0xff] (!%p286_p3)  ;;  %s1816_s17 = smov (!%p286_p3), 96  }
   0x7   : > { %289 = sbr.rel (%p286_p3) target bundleno = 1586 (0x632), region = 44  ;;  %v1754_v5 = vpack.i.bf16 (!%p286_p3), %v420_v3, %v1898_v2  ;;  %v1912_v6 = vld [vmem:[%s2038_s4 + $0x18] sm:$0xff] (!%p286_p3)  ;;  %s1817_s18 = smov (!%p286_p3), 64   ;;  %v1818_v16 = vmov (!%p286_p3), 0.0|0.0   ;;  %vm1819_vm1 = vmmov (!%p286_p3), 0   ;;  %v1820_v22 = vmov (!%p286_p3), 0.0  }
   0x8   : > { %v1759_v7 = vpack.i.bf16 (!%p286_p3), %v1912_v6, %v1906_v4  ;;  %1701 = vmatprep.subr.bf16.mxu0 (!%p286_p3), %v1818_v16  ;;  %1707 = vmatprep.subr.bf16.mxu1 (!%p286_p3), %v1818_v16  ;;  %v1573_v35 = vld [vmem:[%s2036_s2] ss:$0 sm:$0xff] (!%p286_p3)  ;;  %v1714_v39 = vpack.c.bf16 (!%p286_p3), %v420_v3, %v1898_v2  ;;  %v1717_v41 = vpack.c.bf16 (!%p286_p3), %v1912_v6, %v1906_v4  ;;  %vm703_vm2 = vcmask (!%p286_p3), 64512   ;;  %s1821_s30 = smov (!%p286_p3), 120   ;;  %s1823_s9 = smov (!%p286_p3), 104  }
   0x9   : > { %1755 = vrot.lane.b32.xlu1 (!%p286_p3), %v1754_v5, %s1816_s17  ;;  %1636 = vmatprep.mubr.msk.f32.mxu0 (!%p286_p3), %vm1819_vm1, %v1820_v22  ;;  %v1574_v37 = vld [vmem:[%s2037_s3] ss:$0 sm:$0xff] (!%p286_p3)  ;;  %s1825_s14 = smov (!%p286_p3), 16   ;;  %s1826_s15 = smov (!%p286_p3), 24   ;;  %vm1384_vm3 = vcmask (!%p286_p3), 130048   ;;  %vm1386_vm4 = vcmask (!%p286_p3), 195584  }
   0xa   : > { %1647 = vmatprep.mubr.msk.f32.mxu1 (!%p286_p3), %vm1819_vm1, %v1820_v22  ;;  %v1576_v43 = vld [vmem:[%s2039_s5] ss:$0 sm:$0xff] (!%p286_p3) }
   0xd   : > { %1760 = vrot.lane.b32.xlu1 (!%p286_p3), %v1759_v7, %s1816_s17 }
   0xe   : > { %s2047_s24 = smov (!%p343_p4, %s1806_s24), 1 }
   0xf   : > { %s1888_s28 = sshll.u32 %s2047_s24, 3  ;;  %s1596_s10 = sshll.u32 %s2047_s24, 5 }
  0x10   : > { %s346_s8 = scalar_lea.vmem %s2034_s0, %s1888_s28  ;;  %s1990_s13 = scalar_lea.vmem %s2041_s7, %s1596_s10 }
  0x11   : > { %v386_v0 = vld [vmem:[%s346_s8] sm:$0xff]  ;;  %1770 = vrot.lane.b32.xlu1 %v1759_v7, %s1817_s18  ;;  %s1822_s8 = smov 112   ;;  %s1824_s24 = smov 8  }
  0x12   : > { %v390_v1 = vsel %vm389_vm0, %v386_v0, 0.0  ;;  %s366_s21 = scalar_lea.vmem %s2040_s6, %s1888_s28 }
  0x13   : > { %391 = vadd.xlane.f32.xlu0 %v390_v1 }
  0x7b   : > { %v1756_v13 = vpop.permute.xlu1 %1755 }
  0x7c   : > { %v1758_v14 = vunpack.i.h.bf16 %v1756_v13  ;;  %v1757_v15 = vunpack.i.l.bf16 %v1756_v13 }
  0x7e   : > { %v1702_v17 = vpack.c.bf16 %v1758_v14, %v1757_v15 }
  0x7f   : > { %v1761_v18 = vpop.permute.xlu1 %1760 }
  0x80   : > { %v1763_v19 = vunpack.i.h.bf16 %v1761_v18  ;;  %v1762_v20 = vunpack.i.l.bf16 %v1761_v18  ;;  %1703 = vmatpush3.bf16.msra.mxu0 %v1702_v17 }
  0x81   : > { %1704 = vmatprep.subr.bf16.mxu0 %v1818_v16 }
  0x82   : > { %v1705_v21 = vpack.c.bf16 %v1763_v19, %v1762_v20 }
  0x83   : > { %v1771_v25 = vpop.permute.xlu1 %1770 }
  0x84   : > { %1706 = vmatpush3.bf16.msra.mxu0 %v1705_v21  ;;  %v1773_v28 = vunpack.i.h.bf16 %v1771_v25  ;;  %v1772_v31 = vunpack.i.l.bf16 %v1771_v25 }
  0x85   : > { %1713 = vmatprep.subr.bf16.mxu0 %v1818_v16 }
  0x86   : > { %v1711_v33 = vpack.c.bf16 %v1773_v28, %v1772_v31 }
  0xa0   : > { %v392_v8 = vpop.xlane.xlu0 %391 }
  0xa1   : > { %v394_v9 = vmul.f32 0.03125, %v392_v8 }
  0xa3   : > { %v395_v10 = vsub.f32 %v386_v0, %v394_v9 }
  0xa5   : > { %v396_v11 = vmul.f32 %v395_v10, %v395_v10 }
  0xa7   : > { %v397_v12 = vsel %vm389_vm0, %v396_v11, 0.0 }
  0xa8   : > { %398 = vadd.xlane.f32.xlu0 %v397_v12 }
  0xbe   : > { %1765 = vrot.lane.b32.xlu0 %v1754_v5, %s1817_s18  ;;  %s356_s18 = scalar_lea.vmem %s2035_s1, %s1888_s28 }
 0x135   : > { %v399_v23 = vpop.xlane.xlu0 %398 }
 0x136   : > { %v400_v24 = vmul.f32 0.03125, %v399_v23 }
 0x138   : > { %v401_v26 = vadd.f32 1e-05, %v400_v24 }
 0x139   : > { %v1766_v27 = vpop.permute.xlu0 %1765 }
 0x13a   : > { %1774 = vrsqrt.f32 %v401_v26  ;;  %v1768_v29 = vunpack.i.h.bf16 %v1766_v27  ;;  %v1767_v30 = vunpack.i.l.bf16 %v1766_v27 }
 0x13c   : > { %v1708_v32 = vpack.c.bf16 %v1768_v29, %v1767_v30 }
 0x13e   : > { %1709 = vmatpush3.bf16.msra.mxu1 %v1708_v32 }
 0x13f   : > { %1710 = vmatprep.subr.bf16.mxu1 %v1818_v16 }
 0x142   : > { %1712 = vmatpush3.bf16.msra.mxu1 %v1711_v33 }
 0x143   : > { %1661 = vmatprep.subr.mxu1 %v1820_v22 }
 0x144   : > { %v1775_v34 = vpop.eup %1774 }
 0x145   : > { %v403_v36 = vmul.f32 %v1775_v34, %v395_v10 }
 0x147   : > { %v410_v38 = vmul.f32 %v1573_v35, %v403_v36 }
 0x149   : > { %v417_v40 = vadd.f32 %v1574_v37, %v410_v38 }
 0x14b   : > { %418 = vst.msk [vmem:[#allocation2] sm:$0xff] %vm389_vm0, %v417_v40  ;;  %1637 = vmatmul.mubr.msk.f32.vlgmr.msra.gmra.mrb[0].mxu0 %vm389_vm0, %v417_v40  ;;  %1648 = vmatmul.mubr.msk.f32.vlgmr.msra.gmra.mrb[0].mxu1 %vm389_vm0, %v417_v40 }
 0x14c   : > { %1715 = vmatpush3.bf16.msra.mxu0 %v1714_v39  ;;  %1658 = vmatprep.mubr.msk.f32.mxu0 %vm1819_vm1, %v1820_v22 }
 0x14d   : > { %1716 = vmatprep.subr.bf16.mxu0 %v1818_v16  ;;  %1663 = vmatprep.mubr.msk.f32.mxu1 %vm1819_vm1, %v1820_v22 }
 0x150   : > { %1718 = vmatpush3.bf16.msra.mxu0 %v1717_v41 }
 0x151   : > { %1671 = vmatprep.subr.mxu0 %v1820_v22 }
 0x152   : > { %v616_v42 = vld [vmem:[#allocation2] sm:$0xff] }
 0x153   : > { %1659 = vmatmul.mubr.msk.f32.vlgmr.msra.gmra.mrb[2].mxu0 %vm389_vm0, %v616_v42 }
 0x154   : > { %1673 = vmatprep.mubr.msk.f32.mxu0 %vm1819_vm1, %v1820_v22 }
 0x21e   : > { %v508_v44 = vpop.f32.mrb[0].mxu0  ;;  %v606_v45 = vpop.f32.mrb[0].mxu1 }
 0x21f   : > { %512 = vst.msk [vmem:[#allocation3] sm:$0xff] %vm389_vm0, %v508_v44  ;;  %v607_v46 = vadd.f32 %v1576_v43, %v606_v45  ;;  %v1638_v47 = vpop.f32.mrb[1].mxu0  ;;  %v1649_v48 = vpop.f32.mrb[1].mxu1 }
 0x221   : > { %610 = vst.msk [vmem:[#allocation4] sm:$0xff] %vm389_vm0, %v607_v46 }
 0x226   : > { %v691_v49 = vpop.f32.mrb[2].mxu0  ;;  %v700_v50 = vld [vmem:[#allocation3] sm:$0xff] }
 0x227   : > { %695 = vst.msk [vmem:[#allocation5] sm:$0xff] %vm389_vm0, %v691_v49  ;;  %868 = vrot.lane.b32.xlu1 %v700_v50, %s1821_s30  ;;  %v1660_v51 = vpop.f32.mrb[3].mxu0  ;;  %1662 = vmatpush3.xpose.msk.msra.mxu1 %vm703_vm2, %v700_v50 }
 0x228   : > { %1666 = vmatprep.subr.mxu1 %v1820_v22  ;;  %v1955_v53 = vld [vmem:[#allocation4] sm:$0xff] }
 0x22b   : > { %1037 = vrot.lane.b32.xlu1 %v700_v50, %s1822_s8 }
 0x22e   : > { %v698_v52 = vld [vmem:[#allocation5] sm:$0xff] }
 0x22f   : > { %1203 = vrot.lane.b32.xlu0 %v698_v52, %s1823_s9  ;;  %866 = vrot.lane.b32.xlu1 %v698_v52, %s1821_s30 }
 0x230   : > { %1664 = vmatmul.mubr.msk.f32.vlgmr.msra.gmra.mrb[2].mxu1 %vm703_vm2, %v698_v52 }
 0x231   : > { %1667 = vmatpush3.msra.mxu1 %v1955_v53  ;;  %1668 = vmatprep.mubr.msk.f32.mxu1 %vm1819_vm1, %v1820_v22 }
 0x232   : > { %1676 = vmatprep.subr.mxu1 %v1820_v22 }
 0x233   : > { %1035 = vrot.lane.b32.xlu1 %v698_v52, %s1822_s8 }
 0x237   : > { %1205 = vrot.lane.b32.xlu1 %v700_v50, %s1823_s9 }
 0x299   : > { %v869_v54 = vpop.permute.xlu1 %868 }
 0x29a   : > { %1672 = vmatpush3.xpose.msk.msra.mxu0 %vm703_vm2, %v869_v54 }
 0x29b   : > { %1681 = vmatprep.subr.mxu0 %v1820_v22 }
 0x29d   : > { %v1038_v55 = vpop.permute.xlu1 %1037 }
 0x2a1   : > { %v867_v56 = vpop.permute.xlu1 %866  ;;  %v1204_v59 = vpop.permute.xlu0 %1203 }
 0x2a2   : > { %1674 = vmatmul.mubr.msk.f32.vlgmr.msra.gmra.mrb[4].mxu0 %vm703_vm2, %v867_v56 }
 0x2a3   : > { %1682 = vmatpush3.xpose.msk.msra.mxu0 %vm703_vm2, %v1038_v55  ;;  %1683 = vmatprep.mubr.msk.f32.mxu0 %vm1819_vm1, %v1820_v22 }
 0x2a4   : > { %1691 = vmatprep.subr.mxu0 %v1820_v22 }
 0x2a5   : > { %v1036_v57 = vpop.permute.xlu1 %1035 }
 0x2a6   : > { %1684 = vmatmul.mubr.msk.f32.vlgmr.msra.gmra.mrb[6].mxu0 %vm703_vm2, %v1036_v57 }
 0x2a7   : > { %1693 = vmatprep.mubr.msk.f32.mxu0 %vm1819_vm1, %v1820_v22 }
 0x2a9   : > { %v1206_v58 = vpop.permute.xlu1 %1205 }
 0x2aa   : > { %1692 = vmatpush3.xpose.msk.msra.mxu0 %vm703_vm2, %v1206_v58  ;;  %v1388_v58 = vld [vmem:[%s356_s18] sm:$0xff] }
 0x2ad   : > { %1694 = vmatmul.mubr.msk.f32.vlgmr.msra.gmra.mrb[8].mxu0 %vm703_vm2, %v1204_v59 }
 0x303   : > { %v776_v60 = vpop.f32.mrb[2].mxu1 }
 0x304   : > { %v780_v61 = vmul.f32 0.35355338, %v776_v60  ;;  %v1665_v62 = vpop.f32.mrb[3].mxu1 }
 0x306   : > { %v781_v63 = vsel %vm703_vm2, %v780_v61, -inf }
 0x307   : > { %782 = vmax.xlane.f32.xlu1 %v781_v63 }
 0x375   : > { %v940_v0 = vpop.f32.mrb[4].mxu0 }
 0x376   : > { %v944_v1 = vmul.f32 0.35355338, %v940_v0  ;;  %v1675_v2 = vpop.f32.mrb[5].mxu0 }
 0x378   : > { %v945_v3 = vsel %vm703_vm2, %v944_v1, -inf }
 0x379   : > { %946 = vmax.xlane.f32.xlu0 %v945_v3  ;;  %v1109_v4 = vpop.f32.mrb[6].mxu0 }
 0x37a   : > { %v1113_v5 = vmul.f32 0.35355338, %v1109_v4  ;;  %v1685_v6 = vpop.f32.mrb[7].mxu0 }
 0x37c   : > { %v1114_v7 = vsel %vm703_vm2, %v1113_v5, -inf }
 0x37d   : > { %1115 = vmax.xlane.f32.xlu0 %v1114_v7 }
 0x380   : > { %v1277_v8 = vpop.f32.mrb[8].mxu0 }
 0x381   : > { %v1281_v9 = vmul.f32 0.35355338, %v1277_v8  ;;  %v1695_v10 = vpop.f32.mrb[9].mxu0 }
 0x383   : > { %v1282_v11 = vsel %vm703_vm2, %v1281_v9, -inf }
 0x384   : > { %1283 = vmax.xlane.f32.xlu1 %v1282_v11 }
 0x394   : > { %v783_v12 = vpop.xlane.xlu1 %782 }
 0x395   : > { %v784_v13 = vsub.f32 %v780_v61, %v783_v12 }
 0x397   : > { %v785_v14 = vmul.f32 1.442695, %v784_v13 }
 0x399   : > { %1776 = vpow2.f32 %v785_v14 }
 0x3a3   : > { %v1777_v15 = vpop.eup %1776 }
 0x3a4   : > { %v787_v16 = vsel %vm703_vm2, %v1777_v15, 0.0 }
 0x3a5   : > { %788 = vadd.xlane.f32.xlu0 %v787_v16 }
 0x406   : > { %v947_v17 = vpop.xlane.xlu0 %946 }
 0x407   : > { %v948_v18 = vsub.f32 %v944_v1, %v947_v17 }
 0x409   : > { %v949_v19 = vmul.f32 1.442695, %v948_v18 }
 0x40a   : > { %v1116_v20 = vpop.xlane.xlu0 %1115 }
 0x40b   : > { %1778 = vpow2.f32 %v949_v19  ;;  %v1117_v21 = vsub.f32 %v1113_v5, %v1116_v20 }
 0x40d   : > { %v1118_v23 = vmul.f32 1.442695, %v1117_v21 }
 0x40f   : > { %1780 = vpow2.f32 %v1118_v23 }
 0x411   : > { %v1284_v29 = vpop.xlane.xlu1 %1283 }
 0x412   : > { %v1285_v30 = vsub.f32 %v1281_v9, %v1284_v29 }
 0x414   : > { %v1286_v31 = vmul.f32 1.442695, %v1285_v30 }
 0x415   : > { %v1779_v24 = vpop.eup %1778 }
 0x416   : > { %v951_v25 = vsel %vm703_vm2, %v1779_v24, 0.0 }
 0x417   : > { %952 = vadd.xlane.f32.xlu1 %v951_v25 }
 0x419   : > { %v1781_v26 = vpop.eup %1780 }
 0x41a   : > { %v1120_v27 = vsel %vm703_vm2, %v1781_v26, 0.0 }
 0x41b   : > { %1121 = vadd.xlane.f32.xlu0 %v1120_v27 }
 0x428   : > { %1127 = vrot.lane.b32.xlu1 %v1955_v53, %s1822_s8 }
 0x431   : > { %959 = vrot.lane.b32.xlu0 %v1955_v53, %s1821_s30 }
 0x432   : > { %v789_v28 = vpop.xlane.xlu0 %788 }
 0x433   : > { %1782 = vrcp.f32 %v789_v28 }
 0x434   : > { %1784 = vpow2.f32 %v1286_v31 }
 0x43d   : > { %v1783_v32 = vpop.eup %1782 }
 0x43e   : > { %v791_v33 = vmul.f32 %v1783_v32, %v1777_v15  ;;  %v1785_v34 = vpop.eup %1784 }
 0x43f   : > { %v1288_v35 = vsel %vm703_vm2, %v1785_v34, 0.0 }
 0x440   : > { %792 = vst.msk [vmem:[%s1990_s13] sm:$0xff] %vm703_vm2, %v791_v33  ;;  %1669 = vmatmul.mubr.msk.f32.vlgmr.msra.gmra.mrb[4].mxu1 %vm703_vm2, %v791_v33 }
 0x441   : > { %1678 = vmatprep.mubr.msk.f32.mxu1 %vm1819_vm1, %v1820_v22 }
 0x44c   : > { %1289 = vadd.xlane.f32.xlu1 %v1288_v35 }
 0x45d   : > { %1295 = vrot.lane.b32.xlu1 %v1955_v53, %s1823_s9 }
 0x4a4   : > { %v953_v36 = vpop.xlane.xlu1 %952 }
 0x4a5   : > { %1786 = vrcp.f32 %v953_v36 }
 0x4a8   : > { %v1122_v37 = vpop.xlane.xlu0 %1121  ;;  %v1128_v41 = vpop.permute.xlu1 %1127 }
 0x4a9   : > { %1788 = vrcp.f32 %v1122_v37 }
 0x4ac   : > { %v960_v38 = vpop.permute.xlu0 %959 }
 0x4ad   : > { %1677 = vmatpush3.msra.mxu1 %v960_v38 }
 0x4ae   : > { %1686 = vmatprep.subr.mxu1 %v1820_v22 }
 0x4af   : > { %v1787_v39 = vpop.eup %1786 }
 0x4b0   : > { %v955_v40 = vmul.f32 %v1787_v39, %v1779_v24 }
 0x4b2   : > { %1584 = vst.msk [vmem:[%s1990_s13 + $0x8] sm:$0xff] %vm703_vm2, %v955_v40  ;;  %1679 = vmatmul.mubr.msk.f32.vlgmr.msra.gmra.mrb[6].mxu1 %vm703_vm2, %v955_v40 }
 0x4b3   : > { %v1789_v42 = vpop.eup %1788  ;;  %1687 = vmatpush3.msra.mxu1 %v1128_v41  ;;  %1688 = vmatprep.mubr.msk.f32.mxu1 %vm1819_vm1, %v1820_v22 }
 0x4b4   : > { %v1124_v43 = vmul.f32 %v1789_v42, %v1781_v26  ;;  %1696 = vmatprep.subr.mxu1 %v1820_v22 }
 0x4b6   : > { %1588 = vst.msk [vmem:[%s1990_s13 + $0x10] sm:$0xff] %vm703_vm2, %v1124_v43  ;;  %1689 = vmatmul.mubr.msk.f32.vlgmr.msra.gmra.mrb[8].mxu1 %vm703_vm2, %v1124_v43 }
 0x4b7   : > { %1698 = vmatprep.mubr.msk.f32.mxu1 %vm1819_vm1, %v1820_v22 }
 0x4d9   : > { %v1290_v44 = vpop.xlane.xlu1 %1289 }
 0x4da   : > { %1790 = vrcp.f32 %v1290_v44 }
 0x4dd   : > { %v1296_v45 = vpop.permute.xlu1 %1295 }
 0x4de   : > { %1697 = vmatpush3.msra.mxu1 %v1296_v45 }
 0x4e4   : > { %v1791_v46 = vpop.eup %1790 }
 0x4e5   : > { %v1292_v47 = vmul.f32 %v1791_v46, %v1785_v34 }
 0x4e7   : > { %1592 = vst.msk [vmem:[%s1990_s13 + $0x18] sm:$0xff] %vm703_vm2, %v1292_v47  ;;  %1699 = vmatmul.mubr.msk.f32.vlgmr.msra.gmra.mrb[10].mxu1 %vm703_vm2, %v1292_v47 }
 0x513   : > { %v862_v48 = vpop.f32.mrb[4].mxu1 }
 0x514   : > { %v1670_v49 = vpop.f32.mrb[5].mxu1 }
 0x585   : > { %v1031_v50 = vpop.f32.mrb[6].mxu1 }
 0x586   : > { %1372 = vrot.lane.b32.xlu0 %v1031_v50, %s1824_s24  ;;  %v1680_v51 = vpop.f32.mrb[7].mxu1 }
 0x589   : > { %v1199_v52 = vpop.f32.mrb[8].mxu1 }
 0x58a   : > { %1376 = vrot.lane.b32.xlu1 %v1199_v52, %s1825_s14  ;;  %v1690_v22 = vpop.f32.mrb[9].mxu1 }
 0x5ba   : > { %v1367_v53 = vpop.f32.mrb[10].mxu1 }
 0x5bb   : > { %1380 = vrot.lane.b32.xlu0 %v1367_v53, %s1826_s15  ;;  %v1700_v54 = vpop.f32.mrb[11].mxu1 }
 0x5f8   : > { %v1373_v55 = vpop.permute.xlu0 %1372 }
 0x5f9   : > { %v1383_v57 = vsel %vm703_vm2, %v862_v48, %v1373_v55 }
 0x5fc   : > { %v1377_v56 = vpop.permute.xlu1 %1376 }
 0x5fd   : > { %v1385_v59 = vsel %vm1384_vm3, %v1383_v57, %v1377_v56 }
 0x62d   : > { %v1381_v60 = vpop.permute.xlu0 %1380 }
 0x62e   : > { %v1387_v61 = vsel %vm1386_vm4, %v1385_v59, %v1381_v60 }
 0x62f   : > { %v1389_v62 = vadd.f32 %v1388_v58, %v1387_v61 }
 0x631   : > { %1391 = vst.msk [vmem:[%s366_s21] sm:$0xff] %vm389_vm0, %v1389_v62 }
 0x632 PF: > { %s18_s26 = sadd.s32 1, %s1814_s26   ;;  %s2042_s24 = smov %s1810_s25 }
 0x633   : > { %p15_p5 = scmp.ge.s32.totalorder %s18_s26, 4   ;;  %s2043_s25 = smov %s2045_s27 }
 0x635   :  { %17 = sbr.rel (!%p15_p5) target bundleno = 2 (0x2), region = 104 }

// kernel: transformer_forward.4
= control target key start
LH: loop header
LB: loop body
LE: loop exit
PB: predicated region body
PF: predicated region fallthrough
CT: control target
= control target key end

     0   :  { %13 = vsyncpa [#allocation7], 0  ;;  %s2344_s0 = inlined_call_operand.hbm [shape: f32[2,8,32], index: 0, kind: input, shape index: {}, may-alias: {0,1}]   ;;  %s2345_s1 = inlined_call_operand.hbm [shape: f32[2,8,32], index: 1, kind: input, shape index: {}, may-alias: {0,1}]   ;;  %s2346_s2 = inlined_call_operand.vmem [shape: f32[1,32], index: 2, kind: input, shape index: {}]   ;;  %s2347_s3 = inlined_call_operand.vmem [shape: f32[1,32], index: 3, kind: input, shape index: {}]   ;;  %s2348_s4 = inlined_call_operand.vmem [shape: f32[32,96], index: 4, kind: input, shape index: {}]   ;;  %s2349_s5 = inlined_call_operand.vmem [shape: f32[1,32], index: 5, kind: input, shape index: {}]   ;;  %s2350_s6 = inlined_call_operand.vmem [shape: f32[2,8,32], index: 6, kind: output, shape index: {0}]   ;;  %s2351_s7 = inlined_call_operand.vmem [shape: f32[2,4,8,8], index: 7, kind: output, shape index: {1}]  }
   0x1   :  { %15 = vsyncpa [#allocation7 + $0x1], 0 }
   0x2   :  { %16 = vsyncpa [#allocation9], 0 }
   0x3   :  { %18 = vsyncpa [#allocation9 + $0x1], 0  ;;  %s2043_s24 = smov 0   ;;  %s2045_s25 = smov 0  }
   0x4   :  { %s2047_s26 = smov 0   ;;  %s2049_s27 = smov 0  }
   0x5   :  { %s2051_s28 = smov 0   ;;  %s2053_s29 = smov 0  }
   0x6 LB: > { %s1605_s30 = sadd.s32 4294967295, %s1988_s29   ;;  %s43_s8 = sadd.s32 1, %s1984_s28  ;;  %s1988_s29 = sphi %s2053_s29, %s24_s29   ;;  %s1984_s28 = sphi %s2051_s28, %s2365_s28   ;;  %s1980_s27 = sphi %s2049_s27, %s2364_s27   ;;  %s1976_s26 = sphi %s2047_s26, %s2363_s26   ;;  %s1972_s25 = sphi %s2045_s25, %s2362_s25   ;;  %s1968_s24 = sphi %s2043_s24, %s2361_s24  }
   0x7   : > { %p45_p0 = scmp.ge.s32.totalorder %s43_s8, 2  ;;  %s50_s9 = sadd.s32 1, %s1976_s26 }
   0x8   : > { %p57_p1 = scmp.ne.s32.totalorder %s1976_s26, %s1972_s25  ;;  %p58_p2 = scmp.eq.s32.totalorder %s1988_s29, 0 }
   0x9   : > { %s2367_s8 = smov (%p45_p0, %s43_s8), 0  ;;  %p63_p4 = scmp.ne.s32.totalorder %s1972_s25, %s1968_s24 }
   0xa   : > { %p2079_p3 = por %p58_p2, %p57_p1  ;;  %s47_s11 = ssub.s32 %s1984_s28, %s2367_s8 }
   0xb   : > { %p64_p5 = scmp.eq.s32.totalorder %s1605_s30, 0  ;;  %p48_p6 = scmp.eq.s32.totalorder %s47_s11, 0 }
   0xc   : > { %p1776_p8 = scmp.lt.s32.totalorder %s1988_s29, 2  ;;  %s2095_s14 = sand.u32 1, %s1976_s26  }
   0xd   : > { %p2086_p7 = por %p64_p5, %p63_p4  ;;  %s1610_s15 = sshll.u32 %s1984_s28, 7 }
   0xe   : > { %s2092_s13 = scalar_select %p48_p6, %s1976_s26, %s50_s9  }
   0xf   : > { %s2354_s12 = scalar_select %p2086_p7, 1, 0 }
  0x10   : > { %s1609_s16 = sshll.u32 %s2095_s14, 3  ;;  %s2104_s19 = scalar_lea.hbm %s2344_s0, %s1610_s15 }
  0x11   : > { %s277_s20 = scalar_lea.vmem [#allocation6], %s1609_s16  ;;  %p2110_p9 = pnand %p1776_p8, %p2079_p3 }
  0x12   : > { %s284_s21 = sshll.u32 %s277_s20, 4  ;;  %s274_s23 = scalar_lea.sflag [#allocation7], %s2095_s14  ;;  %s2114_s21 = int_to_ptr.vmem [resolvable:$true] %s284_s21 }
  0x13   : > { %s1874_s24 = scalar_lea.hbm %s2104_s19, 128  ;;  %p1876_p13 = pneg %p2110_p9 }
  0x14   : > { %p1875_p12 = scmp.ne.s32.totalorder %s2104_s19, %s1874_s24  ;;  %s1879_s10 = scalar_lea.hbm %s2344_s0, 256 }
  0x15   : > { %p1880_p2 = scmp.lt.u32.totalorder %s2104_s19, %s2344_s0  ;;  %p1881_p3 = scmp.lt.u32.totalorder %s1879_s10, %s1874_s24 }
  0x16   : > { %p1877_p0 = pnand %p1876_p13, %p1875_p12  ;;  %p1883_p5 = scmp.lt.u32.totalorder %s1874_s24, %s2104_s19 }
  0x17   : > { %p1882_p4 = por %p1881_p3, %p1880_p2 }
  0x18   : > { %p1878_p1 = pneg %p1877_p0 }
  0x19   : > { %p1884_p6 = por %p1883_p5, %p1882_p4 }
  0x1b   : > { %p1885_p8 = pnand %p1884_p6, %p1878_p1 }
  0x1d   : > { %1888 = shalt.err (!%p1885_p8)
}
  0x1e   : > { %s1889_s18 = scalar_lea.vmem %s2114_s21, 128  ;;  %s1990_s20 = smov [#allocation6]  }
  0x1f   : > { %p1890_p12 = scmp.ne.s32.totalorder %s2114_s21, %s1889_s18  ;;  %s1894_s30 = sshll.u32 %s1990_s20, 4  ;;  %s1895_s30 = int_to_ptr.vmem [resolvable:$false] %s1894_s30 }
  0x20   : > { %s1896_s9 = scalar_lea.vmem %s1895_s30, 256  ;;  %p1897_p11 = scmp.lt.s32.totalorder %s2114_s21, %s1895_s30 }
  0x21   : > { %p1892_p0 = pnand %p1890_p12, %p1876_p13  ;;  %p1898_p2 = scmp.lt.s32.totalorder %s1896_s9, %s1889_s18 }
  0x23   : > { %p1893_p10 = pneg %p1892_p0  ;;  %p1899_p3 = por %p1898_p2, %p1897_p11 }
  0x25   : > { %p1900_p4 = pnand %p1899_p3, %p1893_p10 }
  0x27   : > { %1903 = shalt.err (!%p1900_p4)
}
  0x28   : > { %1772 = dma.hbm_to_vmem [thread:$0]  (!%p2110_p9), %s2104_s19, 128, %s2114_s21, %s274_s23  }
  0x29   : > { %p2356_p1 = scmp.lt.s32.totalorder %s1988_s29, 3  ;;  %p2357_p5 = scmp.ge.s32.totalorder %s1988_s29, 1 }
  0x2a   : > { %s2157_s17 = scalar_lea.hbm %s2345_s1, %s1610_s15  ;;  %s295_s18 = scalar_lea.vmem [#allocation8], %s1609_s16 }
  0x2b   : > { %p2148_p6 = pnand %p2357_p5, %p2356_p1  ;;  %s304_s20 = sshll.u32 %s295_s18, 4  ;;  %s305_s20 = int_to_ptr.vmem [resolvable:$true] %s304_s20 }
  0x2c   : > { %s292_s19 = scalar_lea.sflag [#allocation9], %s2095_s14  ;;  %s1904_s21 = scalar_lea.hbm %s2157_s17, 128 }
  0x2d   : > { %s2358_s24 = scalar_select %p2148_p6, 1, 0 }
  0x2e   : > { %p1905_p10 = scmp.ne.s32.totalorder %s2157_s17, %s1904_s21  ;;  %s1909_s15 = scalar_lea.hbm %s2345_s1, 256 }
  0x2f   : > { %p1910_p12 = scmp.lt.u32.totalorder %s2157_s17, %s2345_s1  ;;  %p1911_p0 = scmp.lt.u32.totalorder %s1909_s15, %s1904_s21 }
  0x30   : > { %p1907_p11 = pnand %p1905_p10, %p1876_p13  ;;  %p1913_p3 = scmp.lt.u32.totalorder %s1904_s21, %s2157_s17 }
  0x31   : > { %p1912_p2 = por %p1911_p0, %p1910_p12 }
  0x32   : > { %p1908_p8 = pneg %p1907_p11 }
  0x33   : > { %p1914_p4 = por %p1913_p3, %p1912_p2 }
  0x35   : > { %p1915_p1 = pnand %p1914_p4, %p1908_p8 }
  0x37   : > { %1918 = shalt.err (!%p1915_p1)
}
  0x38   : > { %s1919_s14 = scalar_lea.vmem %s305_s20, 128  ;;  %s1991_s16 = smov [#allocation8]  }
  0x39   : > { %p1920_p5 = scmp.ne.s32.totalorder %s305_s20, %s1919_s14  ;;  %s1924_s11 = sshll.u32 %s1991_s16, 4  ;;  %s1925_s11 = int_to_ptr.vmem [resolvable:$false] %s1924_s11 }
  0x3a   : > { %s1926_s18 = scalar_lea.vmem %s1925_s11, 256  ;;  %p1927_p7 = scmp.lt.s32.totalorder %s305_s20, %s1925_s11 }
  0x3b   : > { %p1922_p10 = pnand %p1920_p5, %p1876_p13  ;;  %p1928_p6 = scmp.lt.s32.totalorder %s1926_s18, %s1919_s14 }
  0x3d   : > { %p1923_p11 = pneg %p1922_p10  ;;  %p1929_p0 = por %p1928_p6, %p1927_p7 }
  0x3f   : > { %p1930_p12 = pnand %p1929_p0, %p1923_p11 }
  0x41   : > { %1933 = shalt.err (!%p1930_p12)
}
  0x42   : > { %1775 = dma.hbm_to_vmem [thread:$0]  (!%p2110_p9), %s2157_s17, 128, %s305_s20, %s292_s19  }
  0x43   : > { %p2359_p8 = scmp.ne.s32.totalorder %s2358_s24, 0 }
  0x44   : > { %s315_s21 = sand.u32 (!%p2359_p8), 1, %s1972_s25   ;;  %p2360_p13 = scmp.ne.s32.totalorder (!%p2359_p8), %s2354_s12, 0 }
  0x45   : > { %313 = sbr.rel (%p2359_p8) target bundleno = 1648 (0x670), region = 44  ;;  %s1614_s23 = sshll.u32 (!%p2359_p8), %s315_s21, 3 }
  0x46   : > { %s316_s30 = scalar_lea.sflag (!%p2359_p8), [#allocation7], %s315_s21  ;;  %s319_s15 = scalar_lea.vmem (!%p2359_p8), [#allocation6], %s1614_s23 }
  0x4c   : > { %1959 = dma.done.wait (%p2360_p13), %s316_s30, 128  }
  0x4d   : > { %1961 = vsyncadd (%p2360_p13), %s316_s30, 4294967168  ;;  %s325_s9 = scalar_lea.sflag [#allocation9], %s315_s21  ;;  %s2188_s10 = scalar_lea.vmem [#allocation8], %s1614_s23 }
  0x4e   : > { %1963 = dma.done.wait (%p2360_p13), %s325_s9, 128  }
  0x4f   : > { %1965 = vsyncadd (%p2360_p13), %s325_s9, 4294967168  ;;  %vm413_vm0 = vcmask 261120   ;;  %v410_v0 = vld [vmem:[%s319_s15] sm:$0xff]  ;;  %v2206_v4 = vld [vmem:[%s2348_s4 + $0x10] sm:$0xff]  ;;  %s1992_s11 = smov 96   ;;  %s1993_s18 = smov 64  }
  0x50   : > { %v414_v1 = vsel %vm413_vm0, %v410_v0, 0.0  ;;  %v2198_v2 = vld [vmem:[%s2348_s4] sm:$0xff]  ;;  %v444_v3 = vld [vmem:[%s2348_s4 + $0x8] sm:$0xff]  ;;  %v2212_v6 = vld [vmem:[%s2348_s4 + $0x18] sm:$0xff]  ;;  %v1994_v16 = vmov 0.0|0.0   ;;  %vm1995_vm1 = vmmov 0  }
  0x51   : > { %415 = vadd.xlane.f32.xlu0 %v414_v1  ;;  %v1836_v5 = vpack.i.bf16 %v444_v3, %v2198_v2  ;;  %v1841_v7 = vpack.i.bf16 %v2212_v6, %v2206_v4  ;;  %1747 = vmatprep.subr.bf16.mxu0 %v1994_v16  ;;  %v1996_v22 = vmov 0.0   ;;  %v1619_v35 = vld [vmem:[%s2346_s2] ss:$0 sm:$0xff]  ;;  %v1760_v39 = vpack.c.bf16 %v444_v3, %v2198_v2  ;;  %s1997_s24 = smov 120   ;;  %s1998_s17 = smov 112  }
  0x52   : > { %1753 = vmatprep.subr.bf16.mxu1 %v1994_v16  ;;  %1682 = vmatprep.mubr.msk.f32.mxu0 %vm1995_vm1, %v1996_v22  ;;  %v1620_v37 = vld [vmem:[%s2347_s3] ss:$0 sm:$0xff]  ;;  %v1763_v41 = vpack.c.bf16 %v2212_v6, %v2206_v4  ;;  %vm727_vm2 = vcmask 64512   ;;  %s1999_s20 = smov 104   ;;  %p381_p7 = scmp.lt.s32.totalorder %s1980_s27, 1  ;;  %vm1408_vm3 = vcmask 130048  }
  0x53   : > { %1837 = vrot.lane.b32.xlu1 %v1836_v5, %s1992_s11  ;;  %1693 = vmatprep.mubr.msk.f32.mxu1 %vm1995_vm1, %v1996_v22  ;;  %v1622_v43 = vld [vmem:[%s2349_s5] ss:$0 sm:$0xff]  ;;  %s2002_s21 = smov 24   ;;  %vm1410_vm4 = vcmask 195584  }
  0x54   : > { %s2369_s27 = smov (!%p381_p7, %s1980_s27), 1 }
  0x55   : > { %s1642_s19 = sshll.u32 %s2369_s27, 5  ;;  %s1616_s23 = sshll.u32 %s2369_s27, 3 }
  0x56   : > { %s2294_s16 = scalar_lea.vmem %s2351_s7, %s1642_s19  ;;  %s390_s9 = scalar_lea.vmem %s2350_s6, %s1616_s23 }
  0x57   : > { %1842 = vrot.lane.b32.xlu1 %v1841_v7, %s1992_s11  ;;  %s2000_s11 = smov 8  }
  0x5b   : > { %1852 = vrot.lane.b32.xlu1 %v1841_v7, %s1993_s18 }
  0xc5   : > { %v1838_v13 = vpop.permute.xlu1 %1837 }
  0xc6   : > { %v1840_v14 = vunpack.i.h.bf16 %v1838_v13  ;;  %v1839_v15 = vunpack.i.l.bf16 %v1838_v13 }
  0xc8   : > { %v1748_v17 = vpack.c.bf16 %v1840_v14, %v1839_v15 }
  0xc9   : > { %v1843_v18 = vpop.permute.xlu1 %1842 }
  0xca   : > { %v1845_v19 = vunpack.i.h.bf16 %v1843_v18  ;;  %v1844_v20 = vunpack.i.l.bf16 %v1843_v18  ;;  %1749 = vmatpush3.bf16.msra.mxu0 %v1748_v17 }
  0xcb   : > { %1750 = vmatprep.subr.bf16.mxu0 %v1994_v16 }
  0xcc   : > { %v1751_v21 = vpack.c.bf16 %v1845_v19, %v1844_v20 }
  0xcd   : > { %v1853_v25 = vpop.permute.xlu1 %1852 }
  0xce   : > { %1752 = vmatpush3.bf16.msra.mxu0 %v1751_v21  ;;  %v1855_v28 = vunpack.i.h.bf16 %v1853_v25  ;;  %v1854_v31 = vunpack.i.l.bf16 %v1853_v25 }
  0xcf   : > { %1759 = vmatprep.subr.bf16.mxu0 %v1994_v16 }
  0xd0   : > { %v1757_v33 = vpack.c.bf16 %v1855_v28, %v1854_v31 }
  0xde   : > { %v416_v8 = vpop.xlane.xlu0 %415 }
  0xdf   : > { %v418_v9 = vmul.f32 0.03125, %v416_v8 }
  0xe1   : > { %v419_v10 = vsub.f32 %v410_v0, %v418_v9 }
  0xe3   : > { %v420_v11 = vmul.f32 %v419_v10, %v419_v10 }
  0xe5   : > { %v421_v12 = vsel %vm413_vm0, %v420_v11, 0.0 }
  0xe6   : > { %422 = vadd.xlane.f32.xlu0 %v421_v12 }
  0xfc   : > { %1847 = vrot.lane.b32.xlu0 %v1836_v5, %s1993_s18  ;;  %s2001_s18 = smov 16  }
 0x173   : > { %v423_v23 = vpop.xlane.xlu0 %422 }
 0x174   : > { %v424_v24 = vmul.f32 0.03125, %v423_v23 }
 0x176   : > { %v425_v26 = vadd.f32 1e-05, %v424_v24 }
 0x177   : > { %v1848_v27 = vpop.permute.xlu0 %1847 }
 0x178   : > { %1856 = vrsqrt.f32 %v425_v26  ;;  %v1850_v29 = vunpack.i.h.bf16 %v1848_v27  ;;  %v1849_v30 = vunpack.i.l.bf16 %v1848_v27 }
 0x17a   : > { %v1754_v32 = vpack.c.bf16 %v1850_v29, %v1849_v30 }
 0x17c   : > { %1755 = vmatpush3.bf16.msra.mxu1 %v1754_v32 }
 0x17d   : > { %1756 = vmatprep.subr.bf16.mxu1 %v1994_v16 }
 0x180   : > { %1758 = vmatpush3.bf16.msra.mxu1 %v1757_v33 }
 0x181   : > { %1707 = vmatprep.subr.mxu1 %v1996_v22 }
 0x182   : > { %v1857_v34 = vpop.eup %1856 }
 0x183   : > { %v427_v36 = vmul.f32 %v1857_v34, %v419_v10 }
 0x185   : > { %v434_v38 = vmul.f32 %v1619_v35, %v427_v36 }
 0x187   : > { %v441_v40 = vadd.f32 %v1620_v37, %v434_v38 }
 0x189   : > { %442 = vst.msk [vmem:[#allocation2] sm:$0xff] %vm413_vm0, %v441_v40  ;;  %1683 = vmatmul.mubr.msk.f32.vlgmr.msra.gmra.mrb[0].mxu0 %vm413_vm0, %v441_v40  ;;  %1694 = vmatmul.mubr.msk.f32.vlgmr.msra.gmra.mrb[0].mxu1 %vm413_vm0, %v441_v40 }
 0x18a   : > { %1761 = vmatpush3.bf16.msra.mxu0 %v1760_v39  ;;  %1704 = vmatprep.mubr.msk.f32.mxu0 %vm1995_vm1, %v1996_v22 }
 0x18b   : > { %1762 = vmatprep.subr.bf16.mxu0 %v1994_v16  ;;  %1709 = vmatprep.mubr.msk.f32.mxu1 %vm1995_vm1, %v1996_v22 }
 0x18e   : > { %1764 = vmatpush3.bf16.msra.mxu0 %v1763_v41 }
 0x18f   : > { %1717 = vmatprep.subr.mxu0 %v1996_v22 }
 0x190   : > { %v640_v42 = vld [vmem:[#allocation2] sm:$0xff] }
 0x191   : > { %1705 = vmatmul.mubr.msk.f32.vlgmr.msra.gmra.mrb[2].mxu0 %vm413_vm0, %v640_v42 }
 0x192   : > { %1719 = vmatprep.mubr.msk.f32.mxu0 %vm1995_vm1, %v1996_v22 }
 0x25c   : > { %v532_v44 = vpop.f32.mrb[0].mxu0  ;;  %v630_v45 = vpop.f32.mrb[0].mxu1 }
 0x25d   : > { %536 = vst.msk [vmem:[#allocation3] sm:$0xff] %vm413_vm0, %v532_v44  ;;  %v631_v46 = vadd.f32 %v1622_v43, %v630_v45  ;;  %v1684_v47 = vpop.f32.mrb[1].mxu0  ;;  %v1695_v48 = vpop.f32.mrb[1].mxu1 }
 0x25f   : > { %634 = vst.msk [vmem:[#allocation4] sm:$0xff] %vm413_vm0, %v631_v46 }
 0x264   : > { %v715_v49 = vpop.f32.mrb[2].mxu0  ;;  %v724_v50 = vld [vmem:[#allocation3] sm:$0xff] }
 0x265   : > { %719 = vst.msk [vmem:[#allocation5] sm:$0xff] %vm413_vm0, %v715_v49  ;;  %892 = vrot.lane.b32.xlu1 %v724_v50, %s1997_s24  ;;  %v1706_v51 = vpop.f32.mrb[3].mxu0  ;;  %1708 = vmatpush3.xpose.msk.msra.mxu1 %vm727_vm2, %v724_v50 }
 0x266   : > { %1712 = vmatprep.subr.mxu1 %v1996_v22  ;;  %v2255_v53 = vld [vmem:[#allocation4] sm:$0xff] }
 0x269   : > { %1061 = vrot.lane.b32.xlu1 %v724_v50, %s1998_s17 }
 0x26c   : > { %v722_v52 = vld [vmem:[#allocation5] sm:$0xff] }
 0x26d   : > { %1227 = vrot.lane.b32.xlu0 %v722_v52, %s1999_s20  ;;  %890 = vrot.lane.b32.xlu1 %v722_v52, %s1997_s24 }
 0x26e   : > { %1710 = vmatmul.mubr.msk.f32.vlgmr.msra.gmra.mrb[2].mxu1 %vm727_vm2, %v722_v52 }
 0x26f   : > { %1713 = vmatpush3.msra.mxu1 %v2255_v53  ;;  %1714 = vmatprep.mubr.msk.f32.mxu1 %vm1995_vm1, %v1996_v22 }
 0x270   : > { %1722 = vmatprep.subr.mxu1 %v1996_v22 }
 0x271   : > { %1059 = vrot.lane.b32.xlu1 %v722_v52, %s1998_s17 }
 0x275   : > { %1229 = vrot.lane.b32.xlu1 %v724_v50, %s1999_s20 }
 0x2d7   : > { %v893_v54 = vpop.permute.xlu1 %892 }
 0x2d8   : > { %1718 = vmatpush3.xpose.msk.msra.mxu0 %vm727_vm2, %v893_v54 }
 0x2d9   : > { %1727 = vmatprep.subr.mxu0 %v1996_v22 }
 0x2db   : > { %v1062_v55 = vpop.permute.xlu1 %1061 }
 0x2df   : > { %v891_v56 = vpop.permute.xlu1 %890  ;;  %v1228_v59 = vpop.permute.xlu0 %1227 }
 0x2e0   : > { %1720 = vmatmul.mubr.msk.f32.vlgmr.msra.gmra.mrb[4].mxu0 %vm727_vm2, %v891_v56 }
 0x2e1   : > { %1728 = vmatpush3.xpose.msk.msra.mxu0 %vm727_vm2, %v1062_v55  ;;  %1729 = vmatprep.mubr.msk.f32.mxu0 %vm1995_vm1, %v1996_v22 }
 0x2e2   : > { %1737 = vmatprep.subr.mxu0 %v1996_v22 }
 0x2e3   : > { %v1060_v57 = vpop.permute.xlu1 %1059 }
 0x2e4   : > { %1730 = vmatmul.mubr.msk.f32.vlgmr.msra.gmra.mrb[6].mxu0 %vm727_vm2, %v1060_v57 }
 0x2e5   : > { %1739 = vmatprep.mubr.msk.f32.mxu0 %vm1995_vm1, %v1996_v22 }
 0x2e7   : > { %v1230_v58 = vpop.permute.xlu1 %1229 }
 0x2e8   : > { %1738 = vmatpush3.xpose.msk.msra.mxu0 %vm727_vm2, %v1230_v58  ;;  %v1412_v58 = vld [vmem:[%s2188_s10] sm:$0xff] }
 0x2eb   : > { %1740 = vmatmul.mubr.msk.f32.vlgmr.msra.gmra.mrb[8].mxu0 %vm727_vm2, %v1228_v59 }
 0x341   : > { %v800_v60 = vpop.f32.mrb[2].mxu1 }
 0x342   : > { %v804_v61 = vmul.f32 0.35355338, %v800_v60  ;;  %v1711_v62 = vpop.f32.mrb[3].mxu1 }
 0x344   : > { %v805_v63 = vsel %vm727_vm2, %v804_v61, -inf }
 0x345   : > { %806 = vmax.xlane.f32.xlu1 %v805_v63 }
 0x3b3   : > { %v964_v0 = vpop.f32.mrb[4].mxu0 }
 0x3b4   : > { %v968_v1 = vmul.f32 0.35355338, %v964_v0  ;;  %v1721_v2 = vpop.f32.mrb[5].mxu0 }
 0x3b6   : > { %v969_v3 = vsel %vm727_vm2, %v968_v1, -inf }
 0x3b7   : > { %970 = vmax.xlane.f32.xlu0 %v969_v3  ;;  %v1133_v4 = vpop.f32.mrb[6].mxu0 }
 0x3b8   : > { %v1137_v5 = vmul.f32 0.35355338, %v1133_v4  ;;  %v1731_v6 = vpop.f32.mrb[7].mxu0 }
 0x3ba   : > { %v1138_v7 = vsel %vm727_vm2, %v1137_v5, -inf }
 0x3bb   : > { %1139 = vmax.xlane.f32.xlu0 %v1138_v7 }
 0x3be   : > { %v1301_v8 = vpop.f32.mrb[8].mxu0 }
 0x3bf   : > { %v1305_v9 = vmul.f32 0.35355338, %v1301_v8  ;;  %v1741_v10 = vpop.f32.mrb[9].mxu0 }
 0x3c1   : > { %v1306_v11 = vsel %vm727_vm2, %v1305_v9, -inf }
 0x3c2   : > { %1307 = vmax.xlane.f32.xlu1 %v1306_v11 }
 0x3d2   : > { %v807_v12 = vpop.xlane.xlu1 %806 }
 0x3d3   : > { %v808_v13 = vsub.f32 %v804_v61, %v807_v12 }
 0x3d5   : > { %v809_v14 = vmul.f32 1.442695, %v808_v13 }
 0x3d7   : > { %1858 = vpow2.f32 %v809_v14 }
 0x3e1   : > { %v1859_v15 = vpop.eup %1858 }
 0x3e2   : > { %v811_v16 = vsel %vm727_vm2, %v1859_v15, 0.0 }
 0x3e3   : > { %812 = vadd.xlane.f32.xlu0 %v811_v16 }
 0x444   : > { %v971_v17 = vpop.xlane.xlu0 %970 }
 0x445   : > { %v972_v18 = vsub.f32 %v968_v1, %v971_v17 }
 0x447   : > { %v973_v19 = vmul.f32 1.442695, %v972_v18 }
 0x448   : > { %v1140_v20 = vpop.xlane.xlu0 %1139 }
 0x449   : > { %1860 = vpow2.f32 %v973_v19  ;;  %v1141_v21 = vsub.f32 %v1137_v5, %v1140_v20 }
 0x44b   : > { %v1142_v23 = vmul.f32 1.442695, %v1141_v21 }
 0x44d   : > { %1862 = vpow2.f32 %v1142_v23 }
 0x44f   : > { %v1308_v29 = vpop.xlane.xlu1 %1307 }
 0x450   : > { %v1309_v30 = vsub.f32 %v1305_v9, %v1308_v29 }
 0x452   : > { %v1310_v31 = vmul.f32 1.442695, %v1309_v30 }
 0x453   : > { %v1861_v24 = vpop.eup %1860 }
 0x454   : > { %v975_v25 = vsel %vm727_vm2, %v1861_v24, 0.0 }
 0x455   : > { %976 = vadd.xlane.f32.xlu1 %v975_v25 }
 0x457   : > { %v1863_v26 = vpop.eup %1862 }
 0x458   : > { %v1144_v27 = vsel %vm727_vm2, %v1863_v26, 0.0 }
 0x459   : > { %1145 = vadd.xlane.f32.xlu0 %v1144_v27 }
 0x466   : > { %1151 = vrot.lane.b32.xlu1 %v2255_v53, %s1998_s17 }
 0x46f   : > { %983 = vrot.lane.b32.xlu0 %v2255_v53, %s1997_s24 }
 0x470   : > { %v813_v28 = vpop.xlane.xlu0 %812 }
 0x471   : > { %1864 = vrcp.f32 %v813_v28 }
 0x472   : > { %1866 = vpow2.f32 %v1310_v31 }
 0x47b   : > { %v1865_v32 = vpop.eup %1864 }
 0x47c   : > { %v815_v33 = vmul.f32 %v1865_v32, %v1859_v15  ;;  %v1867_v34 = vpop.eup %1866 }
 0x47d   : > { %v1312_v35 = vsel %vm727_vm2, %v1867_v34, 0.0 }
 0x47e   : > { %1715 = vmatmul.mubr.msk.f32.vlgmr.msra.gmra.mrb[4].mxu1 %vm727_vm2, %v815_v33  ;;  %816 = vst.msk [vmem:[%s2294_s16] sm:$0xff] %vm727_vm2, %v815_v33 }
 0x47f   : > { %1724 = vmatprep.mubr.msk.f32.mxu1 %vm1995_vm1, %v1996_v22 }
 0x48a   : > { %1313 = vadd.xlane.f32.xlu1 %v1312_v35 }
 0x49b   : > { %1319 = vrot.lane.b32.xlu1 %v2255_v53, %s1999_s20 }
 0x4e2   : > { %v977_v36 = vpop.xlane.xlu1 %976 }
 0x4e3   : > { %1868 = vrcp.f32 %v977_v36 }
 0x4e6   : > { %v1146_v37 = vpop.xlane.xlu0 %1145  ;;  %v1152_v41 = vpop.permute.xlu1 %1151 }
 0x4e7   : > { %1870 = vrcp.f32 %v1146_v37 }
 0x4ea   : > { %v984_v38 = vpop.permute.xlu0 %983 }
 0x4eb   : > { %1723 = vmatpush3.msra.mxu1 %v984_v38 }
 0x4ec   : > { %1732 = vmatprep.subr.mxu1 %v1996_v22 }
 0x4ed   : > { %v1869_v39 = vpop.eup %1868 }
 0x4ee   : > { %v979_v40 = vmul.f32 %v1869_v39, %v1861_v24 }
 0x4f0   : > { %1725 = vmatmul.mubr.msk.f32.vlgmr.msra.gmra.mrb[6].mxu1 %vm727_vm2, %v979_v40  ;;  %1630 = vst.msk [vmem:[%s2294_s16 + $0x8] sm:$0xff] %vm727_vm2, %v979_v40 }
 0x4f1   : > { %v1871_v42 = vpop.eup %1870  ;;  %1733 = vmatpush3.msra.mxu1 %v1152_v41  ;;  %1734 = vmatprep.mubr.msk.f32.mxu1 %vm1995_vm1, %v1996_v22 }
 0x4f2   : > { %v1148_v43 = vmul.f32 %v1871_v42, %v1863_v26  ;;  %1742 = vmatprep.subr.mxu1 %v1996_v22 }
 0x4f4   : > { %1735 = vmatmul.mubr.msk.f32.vlgmr.msra.gmra.mrb[8].mxu1 %vm727_vm2, %v1148_v43  ;;  %1634 = vst.msk [vmem:[%s2294_s16 + $0x10] sm:$0xff] %vm727_vm2, %v1148_v43 }
 0x4f5   : > { %1744 = vmatprep.mubr.msk.f32.mxu1 %vm1995_vm1, %v1996_v22 }
 0x517   : > { %v1314_v44 = vpop.xlane.xlu1 %1313 }
 0x518   : > { %1872 = vrcp.f32 %v1314_v44 }
 0x51b   : > { %v1320_v45 = vpop.permute.xlu1 %1319 }
 0x51c   : > { %1743 = vmatpush3.msra.mxu1 %v1320_v45 }
 0x522   : > { %v1873_v46 = vpop.eup %1872 }
 0x523   : > { %v1316_v47 = vmul.f32 %v1873_v46, %v1867_v34 }
 0x525   : > { %1745 = vmatmul.mubr.msk.f32.vlgmr.msra.gmra.mrb[10].mxu1 %vm727_vm2, %v1316_v47  ;;  %1638 = vst.msk [vmem:[%s2294_s16 + $0x18] sm:$0xff] %vm727_vm2, %v1316_v47 }
 0x551   : > { %v886_v48 = vpop.f32.mrb[4].mxu1 }
 0x552   : > { %v1716_v49 = vpop.f32.mrb[5].mxu1 }
 0x5c3   : > { %v1055_v50 = vpop.f32.mrb[6].mxu1 }
 0x5c4   : > { %1396 = vrot.lane.b32.xlu0 %v1055_v50, %s2000_s11  ;;  %v1726_v51 = vpop.f32.mrb[7].mxu1 }
 0x5c7   : > { %v1223_v52 = vpop.f32.mrb[8].mxu1 }
 0x5c8   : > { %1400 = vrot.lane.b32.xlu1 %v1223_v52, %s2001_s18  ;;  %v1736_v22 = vpop.f32.mrb[9].mxu1 }
 0x5f8   : > { %v1391_v53 = vpop.f32.mrb[10].mxu1 }
 0x5f9   : > { %1404 = vrot.lane.b32.xlu0 %v1391_v53, %s2002_s21  ;;  %v1746_v54 = vpop.f32.mrb[11].mxu1 }
 0x636   : > { %v1397_v55 = vpop.permute.xlu0 %1396 }
 0x637   : > { %v1407_v57 = vsel %vm727_vm2, %v886_v48, %v1397_v55 }
 0x63a   : > { %v1401_v56 = vpop.permute.xlu1 %1400 }
 0x63b   : > { %v1409_v59 = vsel %vm1408_vm3, %v1407_v57, %v1401_v56 }
 0x66b   : > { %v1405_v60 = vpop.permute.xlu0 %1404 }
 0x66c   : > { %v1411_v61 = vsel %vm1410_vm4, %v1409_v59, %v1405_v60 }
 0x66d   : > { %v1413_v62 = vadd.f32 %v1412_v58, %v1411_v61 }
 0x66f   : > { %1415 = vst.msk [vmem:[%s390_s9] sm:$0xff] %vm413_vm0, %v1413_v62 }
 0x670 PF: > { %s24_s29 = sadd.s32 1, %s1988_s29   ;;  %s2361_s24 = smov %s1972_s25 }
 0x671   : > { %p21_p9 = scmp.ge.s32.totalorder %s24_s29, 4   ;;  %s2362_s25 = smov %s1976_s26 }
 0x672   : > { %s2363_s26 = smov %s2092_s13  ;;  %s2364_s27 = smov %s1984_s28 }
 0x673   : > { %s2365_s28 = smov %s2367_s8  ;;  %23 = sbr.rel (!%p21_p9) target bundleno = 6 (0x6), region = 124 }
 0x67a   :  { %1478 = vsyncpa [#allocation7], 1 }
 0x67b   :  { %1480 = vsyncpa [#allocation7 + $0x1], 1 }
 0x67c   :  { %1481 = vsyncpa [#allocation9], 1 }
 0x67d   :  { %1483 = vsyncpa [#allocation9 + $0x1], 1 }

</bundles_post_ra>
